<compile_context>
chip_gen: v5e
topology: v5e:2x2
jax: 0.10.0
libtpu: 0.0.40
codegen_flags: <defaults>
</compile_context>

<pallas_src>
import jax
import jax.numpy as jnp
from jax.experimental import pallas as pl
from jax.experimental.pallas import tpu as pltpu

# ----------------------------- configuration --------------------------------
BATCH = 2
IN_C, IN_H, IN_W = 4, 16, 16
INPUT_DIM = IN_C * IN_H * IN_W          # 1024
TRANSFORMER_DIM = 32
NUM_HEADS = 4                            # seq_len == 1 -> head count is moot
MLP_DIM = 32
NUM_LAYERS = 2
MLP_LAYERS = 3
OUTPUT_DIM = 8
FFN_DIM = 2048                           # nn.TransformerEncoderLayer default
LN_EPS = 1e-5
OUT_PAD = 128                            # lane-dense padded output width
N_HEAD = MLP_LAYERS - 1                  # number of (Linear,ReLU,LN) head blocks

# Stacking the MLP-head weights into one slab assumes equal widths (true here).
assert TRANSFORMER_DIM == MLP_DIM

# Rough cost hints for XLA's scheduler (advisory only).
_FLOPS = (2 * BATCH * INPUT_DIM * TRANSFORMER_DIM
          + NUM_LAYERS * (2 * BATCH * TRANSFORMER_DIM * TRANSFORMER_DIM
                          + 4 * BATCH * TRANSFORMER_DIM * FFN_DIM)
          + N_HEAD * 2 * BATCH * TRANSFORMER_DIM * MLP_DIM
          + 2 * BATCH * MLP_DIM * OUT_PAD)
_BYTES = (BATCH * INPUT_DIM * 4 + INPUT_DIM * TRANSFORMER_DIM * 2
          + NUM_LAYERS * (TRANSFORMER_DIM * TRANSFORMER_DIM * 4
                          + 2 * TRANSFORMER_DIM * FFN_DIM * 2
                          + FFN_DIM * 2 + 6 * TRANSFORMER_DIM * 4)
          + N_HEAD * (TRANSFORMER_DIM * MLP_DIM * 4 + 3 * MLP_DIM * 4)
          + MLP_DIM * OUT_PAD * 4 + 2 * OUT_PAD * 4 + BATCH * OUT_PAD * 4)


# ------------------------------ shared math ----------------------------------
def _layernorm(x, gamma, beta, eps=LN_EPS):
    mean = jnp.mean(x, axis=-1, keepdims=True)
    var = jnp.mean((x - mean) ** 2, axis=-1, keepdims=True)
    return (x - mean) * jax.lax.rsqrt(var + eps) * gamma + beta


# ------------------------------ kernel body ----------------------------------
def _kernel(x_ref, fc1w_ref, wattn_ref, w1_ref, b1_ref, w2_ref, tvec_ref,
            headw_ref, headv_ref, outw_ref, misc_ref, out_ref, x_sc):
    layer = pl.program_id(0)

    # ---- fc1 (first grid step only) -----------------------------------------
    @pl.when(layer == 0)
    def _():
        # bf16 activation x bf16 weight -> MXU directly, f32 accumulation.
        x0 = x_ref[...].astype(jnp.bfloat16)
        fc1_b = misc_ref[0:1, 0:TRANSFORMER_DIM]                # (1, D)
        x_sc[...] = (
            jnp.dot(x0, fc1w_ref[...], preferred_element_type=jnp.float32)
            + fc1_b)

    # ---- transformer encoder layer `layer` (post-LN, relu FFN) --------------
    x = x_sc[...]
    tv = tvec_ref[...]                   # (6, D): b_attn, g1, be1, g2, be2, b2
    b_attn, g1, be1 = tv[0:1, :], tv[1:2, :], tv[2:3, :]
    g2, be2, b2 = tv[3:4, :], tv[4:5, :], tv[5:6, :]

    # seq_len == 1: softmax over a single key == 1, so MHA reduces exactly to
    # out_proj(v_proj(x)); the V/O projections are pre-folded into one matmul.
    # (This fold is only valid for sequence length 1.)
    sa = jnp.dot(x, wattn_ref[...], preferred_element_type=jnp.float32) + b_attn
    x = _layernorm(x + sa, g1, be1)

    # FFN: bf16 activations into the MXU (no f32 upcast of the bf16 weights).
    h = (jnp.dot(x.astype(jnp.bfloat16), w1_ref[...],
                 preferred_element_type=jnp.float32)
         + b1_ref[...].astype(jnp.float32))
    h = jnp.maximum(h, 0.0)
    ff = jnp.dot(h.astype(jnp.bfloat16), w2_ref[...],
                 preferred_element_type=jnp.float32) + b2
    x = _layernorm(x + ff, g2, be2)
    x_sc[...] = x

    # ---- MLP head + final projection (last grid step only) ------------------
    @pl.when(layer == pl.num_programs(0) - 1)
    def _():
        h2 = x_sc[...]
        for i in range(N_HEAD):
            hv = headv_ref[i]            # (3, D): bias, gamma, beta
            h2 = jnp.dot(h2, headw_ref[i],
                         preferred_element_type=jnp.float32) + hv[0:1, :]
            h2 = jnp.maximum(h2, 0.0)
            h2 = _layernorm(h2, hv[1:2, :], hv[2:3, :])
            # TODO(synk): nn.Dropout is identity at inference; train-mode
            # stochastic dropout is not implemented.
        out_b = misc_ref[1:2, :]         # (1, OUT_PAD), zero past OUTPUT_DIM
        out_ref[...] = (
            jnp.dot(h2, outw_ref[...], preferred_element_type=jnp.float32)
            + out_b)


# ------------------------------ parameters -----------------------------------
def init_raw_params(key):
    """Raw (PyTorch-equivalent) parameters, stacked per layer.
    Weights are (fan_in, fan_out) so y = x @ W + b.  Large weights (and the
    FFN bias b1) are stored in bf16."""
    def linear(k, fan_in, fan_out, dtype=jnp.float32):
        k1, k2 = jax.random.split(k)
        bound = 1.0 / (fan_in ** 0.5)
        w = jax.random.uniform(k1, (fan_in, fan_out), jnp.float32, -bound, bound)
        b = jax.random.uniform(k2, (fan_out,), jnp.float32, -bound, bound)
        return w.astype(dtype), b

    keys = iter(jax.random.split(key, 64))
    raw = {}
    raw['fc1_w'], raw['fc1_b'] = linear(next(keys), INPUT_DIM, TRANSFORMER_DIM,
                                        jnp.bfloat16)

    acc = {n: [] for n in ('wv', 'bv', 'wo', 'bo', 'g1', 'be1', 'g2', 'be2',
                           'w1', 'b1', 'w2', 'b2')}
    for _ in range(NUM_LAYERS):
        w, b = linear(next(keys), TRANSFORMER_DIM, TRANSFORMER_DIM)   # V slice
        acc['wv'].append(w); acc['bv'].append(b)
        w, b = linear(next(keys), TRANSFORMER_DIM, TRANSFORMER_DIM)   # out_proj
        acc['wo'].append(w); acc['bo'].append(b)
        acc['g1'].append(jnp.ones((TRANSFORMER_DIM,), jnp.float32))
        acc['be1'].append(jnp.zeros((TRANSFORMER_DIM,), jnp.float32))
        acc['g2'].append(jnp.ones((TRANSFORMER_DIM,), jnp.float32))
        acc['be2'].append(jnp.zeros((TRANSFORMER_DIM,), jnp.float32))
        w, b = linear(next(keys), TRANSFORMER_DIM, FFN_DIM, jnp.bfloat16)
        acc['w1'].append(w); acc['b1'].append(b.astype(jnp.bfloat16))
        w, b = linear(next(keys), FFN_DIM, TRANSFORMER_DIM, jnp.bfloat16)
        acc['w2'].append(w); acc['b2'].append(b)
    for n, v in acc.items():
        raw[n] = jnp.stack(v)

    hw, hb, hg, hbe = [], [], [], []
    in_dim = TRANSFORMER_DIM
    for _ in range(N_HEAD):
        w, b = linear(next(keys), in_dim, MLP_DIM)
        hw.append(w); hb.append(b)
        hg.append(jnp.ones((MLP_DIM,), jnp.float32))
        hbe.append(jnp.zeros((MLP_DIM,), jnp.float32))
        in_dim = MLP_DIM
    raw['head_w'], raw['head_b'] = jnp.stack(hw), jnp.stack(hb)
    raw['head_g'], raw['head_be'] = jnp.stack(hg), jnp.stack(hbe)
    raw['out_w'], raw['out_b'] = linear(next(keys), in_dim, OUTPUT_DIM)
    return raw


def pack_params(raw):
    """One-time packing of raw params into kernel operands (fold V/O, stack
    small vectors into slabs, pad the output projection to 128 lanes)."""
    w_attn = jnp.einsum('lij,ljk->lik', raw['wv'], raw['wo'])            # (L,D,D)
    b_attn = jnp.einsum('li,lij->lj', raw['bv'], raw['wo']) + raw['bo']  # (L,D)
    tvecs = jnp.stack([b_attn, raw['g1'], raw['be1'],
                       raw['g2'], raw['be2'], raw['b2']], axis=1)        # (L,6,D)
    head_vecs = jnp.stack([raw['head_b'], raw['head_g'], raw['head_be']],
                          axis=1)                                        # (H,3,D)
    outw_pad = jnp.zeros((MLP_DIM, OUT_PAD), jnp.float32)
    outw_pad = outw_pad.at[:, :OUTPUT_DIM].set(raw['out_w'])
    misc = jnp.zeros((2, OUT_PAD), jnp.float32)
    misc = misc.at[0, :TRANSFORMER_DIM].set(raw['fc1_b'])
    misc = misc.at[1, :OUTPUT_DIM].set(raw['out_b'])
    b1 = raw['b1'][:, None, :]                                           # (L,1,F) bf16
    return (raw['fc1_w'], w_attn, raw['w1'], b1, raw['w2'], tvecs,
            raw['head_w'], head_vecs, outw_pad, misc)


# ------------------------------ wrapper ---------------------------------------
@jax.jit
def transformer_with_mlp(x_nchw, packed):
    (fc1_w, w_attn, w1, b1, w2, tvecs, head_w, head_vecs, outw_pad, misc) = packed
    b = x_nchw.shape[0]
    x2 = x_nchw.reshape(b, -1).astype(jnp.float32)     # torch .view(B, -1)

    D, F = TRANSFORMER_DIM, FFN_DIM
    const2 = lambda l: (0, 0)
    const3 = lambda l: (0, 0, 0)
    per_layer = lambda l: (l, 0, 0)

    grid_spec = pltpu.PrefetchScalarGridSpec(
        num_scalar_prefetch=0,
        grid=(NUM_LAYERS,),
        in_specs=[
            pl.BlockSpec((b, INPUT_DIM), const2),        # x (loaded once)
            pl.BlockSpec((INPUT_DIM, D), const2),        # fc1_w  bf16 (once)
            pl.BlockSpec((None, D, D), per_layer),       # folded attn W (per layer)
            pl.BlockSpec((None, D, F), per_layer),       # FFN w1 bf16 (per layer)
            pl.BlockSpec((None, 1, F), per_layer),       # FFN b1 bf16 (per layer)
            pl.BlockSpec((None, F, D), per_layer),       # FFN w2 bf16 (per layer)
            pl.BlockSpec((None, 6, D), per_layer),       # packed per-layer vectors
            pl.BlockSpec((N_HEAD, D, MLP_DIM), const3),  # MLP head weights (once)
            pl.BlockSpec((N_HEAD, 3, MLP_DIM), const3),  # MLP head vectors (once)
            pl.BlockSpec((MLP_DIM, OUT_PAD), const2),    # padded output proj
            pl.BlockSpec((2, OUT_PAD), const2),          # misc: fc1_b / out_b
        ],
        # NOTE: out_spec must stay constant-index: out_ref is only written on
        # the last grid step and relies on the final writeback of this block.
        out_specs=pl.BlockSpec((b, OUT_PAD), const2),    # lane-dense output
        scratch_shapes=[pltpu.VMEM((b, D), jnp.float32)],  # activation carry
    )

    out_pad = pl.pallas_call(
        _kernel,
        out_shape=jax.ShapeDtypeStruct((b, OUT_PAD), jnp.float32),
        grid_spec=grid_spec,
        compiler_params=pltpu.CompilerParams(
            dimension_semantics=("arbitrary",)),
        cost_estimate=pl.CostEstimate(
            flops=_FLOPS, transcendentals=16, bytes_accessed=_BYTES),
    )(x2, fc1_w, w_attn, w1, b1, w2, tvecs, head_w, head_vecs, outw_pad, misc)

    return out_pad[:, :OUTPUT_DIM]


# --------------------------- pure-JAX reference -------------------------------
def reference(x_nchw, raw, bf16_acts=False):
    """Unfolded, unpadded reference mirroring the PyTorch module (eval mode).

    bf16_acts=False: f32 activations throughout (bf16-stored weights upcast) —
        the "true model" baseline; the kernel matches it at the ~1e-3 level.
    bf16_acts=True: activations cast to bf16 before the fc1/FFN contractions,
        mirroring the kernel's MXU numerics exactly.
    """
    hp = jax.lax.Precision.HIGHEST

    def big_dot(a, w_bf16):
        if bf16_acts:
            return jnp.dot(a.astype(jnp.bfloat16), w_bf16,
                           preferred_element_type=jnp.float32)
        return jnp.dot(a, w_bf16.astype(jnp.float32), precision=hp)

    x = x_nchw.reshape(x_nchw.shape[0], -1).astype(jnp.float32)
    x = big_dot(x, raw['fc1_w']) + raw['fc1_b']
    for l in range(NUM_LAYERS):
        v = jnp.dot(x, raw['wv'][l], precision=hp) + raw['bv'][l]
        sa = jnp.dot(v, raw['wo'][l], precision=hp) + raw['bo'][l]
        x = _layernorm(x + sa, raw['g1'][l], raw['be1'][l])
        h = jnp.maximum(big_dot(x, raw['w1'][l])
                        + raw['b1'][l].astype(jnp.float32), 0.0)
        ff = big_dot(h, raw['w2'][l]) + raw['b2'][l]
        x = _layernorm(x + ff, raw['g2'][l], raw['be2'][l])
    for i in range(N_HEAD):
        x = jnp.maximum(jnp.dot(x, raw['head_w'][i], precision=hp)
                        + raw['head_b'][i], 0.0)
        x = _layernorm(x, raw['head_g'][i], raw['head_be'][i])
    return jnp.dot(x, raw['out_w'], precision=hp) + raw['out_b']


# ------------------------------- main ------------------------------------------
if __name__ == "__main__":
    key = jax.random.PRNGKey(0)
    kx, kp = jax.random.split(key)
    x = jax.random.normal(kx, (BATCH, IN_C, IN_H, IN_W), jnp.float32)

    raw = init_raw_params(kp)
    packed = pack_params(raw)            # one-time, outside the timed path

    out = transformer_with_mlp(x, packed)
    out = jax.block_until_ready(out)

    assert out.shape == (BATCH, OUTPUT_DIM), out.shape

    # Tight check vs a reference that mirrors the kernel's bf16-activation MXU
    # path (verifies the kernel implements the math correctly).
    ref_exact = reference(x, raw, bf16_acts=True)
    assert jnp.allclose(out, ref_exact, atol=1e-3, rtol=1e-3), (out, ref_exact)

    # Looser check vs the f32-activation reference: bf16 inputs to the K=1024 /
    # K=2048 contractions give ~1e-3-level deviation from a true f32 model.
    ref_f32 = reference(x, raw, bf16_acts=False)
    assert jnp.allclose(out, ref_f32, atol=1e-2, rtol=1e-2), (out, ref_f32)

    print("KERNEL_OK")
</pallas_src>

<mosaic_0001>
module attributes {stable_mosaic.version = 11 : i64} {
  func.func @_kernel(%arg0: i32, %arg1: memref<2x1024xf32, #tpu.memory_space<vmem>>, %arg2: memref<1024x32xbf16, #tpu.memory_space<vmem>>, %arg3: memref<1x32x32xf32, #tpu.memory_space<vmem>>, %arg4: memref<1x32x2048xbf16, #tpu.memory_space<vmem>>, %arg5: memref<1x1x2048xbf16, #tpu.memory_space<vmem>>, %arg6: memref<1x2048x32xbf16, #tpu.memory_space<vmem>>, %arg7: memref<1x6x32xf32, #tpu.memory_space<vmem>>, %arg8: memref<2x32x32xf32, #tpu.memory_space<vmem>>, %arg9: memref<2x3x32xf32, #tpu.memory_space<vmem>>, %arg10: memref<32x128xf32, #tpu.memory_space<vmem>>, %arg11: memref<2x128xf32, #tpu.memory_space<vmem>>, %arg12: memref<2x128xf32, #tpu.memory_space<vmem>>, %arg13: memref<2x32xf32, #tpu.memory_space<vmem>>) attributes {dimension_semantics = [#tpu.dimension_semantics<arbitrary>], iteration_bounds = array<i64: 2>, scalar_prefetch = 0 : i64, scratch_operands = 1 : i64, tpu.core_type = #tpu.core_type<tc>, window_params = [{pipeline_mode = #tpu.pipeline_mode<synchronous>, transform_indices = @transform_0, window_bounds = array<i64: 2, 1024>}, {pipeline_mode = #tpu.pipeline_mode<synchronous>, transform_indices = @transform_1, window_bounds = array<i64: 1024, 32>}, {transform_indices = @transform_2, window_bounds = array<i64: 1, 32, 32>}, {transform_indices = @transform_3, window_bounds = array<i64: 1, 32, 2048>}, {transform_indices = @transform_4, window_bounds = array<i64: 1, 1, 2048>}, {transform_indices = @transform_5, window_bounds = array<i64: 1, 2048, 32>}, {transform_indices = @transform_6, window_bounds = array<i64: 1, 6, 32>}, {pipeline_mode = #tpu.pipeline_mode<synchronous>, transform_indices = @transform_7, window_bounds = array<i64: 2, 32, 32>}, {pipeline_mode = #tpu.pipeline_mode<synchronous>, transform_indices = @transform_8, window_bounds = array<i64: 2, 3, 32>}, {pipeline_mode = #tpu.pipeline_mode<synchronous>, transform_indices = @transform_9, window_bounds = array<i64: 32, 128>}, {pipeline_mode = #tpu.pipeline_mode<synchronous>, transform_indices = @transform_10, window_bounds = array<i64: 2, 128>}, {pipeline_mode = #tpu.pipeline_mode<synchronous>, transform_indices = @transform_11, window_bounds = array<i64: 2, 128>}]} {
    %c0_i32 = arith.constant 0 : i32
    %0 = arith.cmpi eq, %arg0, %c0_i32 : i32
    %1 = arith.extui %0 : i1 to i32
    %c0_i32_0 = arith.constant 0 : i32
    %2 = arith.cmpi ne, %1, %c0_i32_0 : i32
    scf.if %2 {
      %c0_33 = arith.constant 0 : index
      %c0_34 = arith.constant 0 : index
      %84 = vector.load %arg1[%c0_33, %c0_34] : memref<2x1024xf32, #tpu.memory_space<vmem>>, vector<2x1024xf32>
      %85 = arith.truncf %84 : vector<2x1024xf32> to vector<2x1024xbf16>
      %c0_35 = arith.constant 0 : index
      %c0_36 = arith.constant 0 : index
      %86 = vector.load %arg11[%c0_35, %c0_36] : memref<2x128xf32, #tpu.memory_space<vmem>>, vector<1x32xf32>
      %c0_37 = arith.constant 0 : index
      %c0_38 = arith.constant 0 : index
      %87 = vector.load %arg2[%c0_37, %c0_38] : memref<1024x32xbf16, #tpu.memory_space<vmem>>, vector<1024x32xbf16>
      %cst_39 = arith.constant dense<0.000000e+00> : vector<2x32xf32>
      %88 = tpu.matmul %85, %87, %cst_39 {dimension_numbers = #tpu.dot_dimension_numbers<[1], [0], [0], [1], [0, 0, 1, 1], [], []>} : vector<2x1024xbf16>, vector<1024x32xbf16>, vector<2x32xf32> -> vector<2x32xf32>
      %89 = vector.broadcast %86 : vector<1x32xf32> to vector<2x32xf32>
      %90 = arith.addf %88, %89 : vector<2x32xf32>
      %c0_40 = arith.constant 0 : index
      %c0_41 = arith.constant 0 : index
      %91 = vector.load %arg13[%c0_40, %c0_41] : memref<2x32xf32, #tpu.memory_space<vmem>>, vector<2x32xf32>
      tpu.vector_store %arg13[%c0_40, %c0_41], %90 {strides = array<i32>} : memref<2x32xf32, #tpu.memory_space<vmem>>, vector<2x32xf32>,
    } else {
    }
    %c0 = arith.constant 0 : index
    %c0_1 = arith.constant 0 : index
    %3 = vector.load %arg13[%c0, %c0_1] : memref<2x32xf32, #tpu.memory_space<vmem>>, vector<2x32xf32>
    %c0_2 = arith.constant 0 : index
    %c0_3 = arith.constant 0 : index
    %c0_4 = arith.constant 0 : index
    %4 = vector.load %arg7[%c0_2, %c0_3, %c0_4] : memref<1x6x32xf32, #tpu.memory_space<vmem>>, vector<1x6x32xf32>
    %5 = vector.shape_cast %4 : vector<1x6x32xf32> to vector<6x32xf32>
    %6 = vector.extract_strided_slice %5 {offsets = [0, 0], sizes = [1, 32], strides = [1, 1]} : vector<6x32xf32> to vector<1x32xf32>
    %7 = vector.extract_strided_slice %5 {offsets = [1, 0], sizes = [1, 32], strides = [1, 1]} : vector<6x32xf32> to vector<1x32xf32>
    %8 = vector.extract_strided_slice %5 {offsets = [2, 0], sizes = [1, 32], strides = [1, 1]} : vector<6x32xf32> to vector<1x32xf32>
    %9 = vector.extract_strided_slice %5 {offsets = [3, 0], sizes = [1, 32], strides = [1, 1]} : vector<6x32xf32> to vector<1x32xf32>
    %10 = vector.extract_strided_slice %5 {offsets = [4, 0], sizes = [1, 32], strides = [1, 1]} : vector<6x32xf32> to vector<1x32xf32>
    %11 = vector.extract_strided_slice %5 {offsets = [5, 0], sizes = [1, 32], strides = [1, 1]} : vector<6x32xf32> to vector<1x32xf32>
    %c0_5 = arith.constant 0 : index
    %c0_6 = arith.constant 0 : index
    %c0_7 = arith.constant 0 : index
    %12 = vector.load %arg3[%c0_5, %c0_6, %c0_7] : memref<1x32x32xf32, #tpu.memory_space<vmem>>, vector<1x32x32xf32>
    %13 = vector.shape_cast %12 : vector<1x32x32xf32> to vector<32x32xf32>
    %cst = arith.constant dense<0.000000e+00> : vector<2x32xf32>
    %14 = tpu.matmul %3, %13, %cst {dimension_numbers = #tpu.dot_dimension_numbers<[1], [0], [0], [1], [0, 0, 1, 1], [], []>} : vector<2x32xf32>, vector<32x32xf32>, vector<2x32xf32> -> vector<2x32xf32>
    %15 = vector.broadcast %6 : vector<1x32xf32> to vector<2x32xf32>
    %16 = arith.addf %14, %15 : vector<2x32xf32>
    %17 = arith.addf %3, %16 : vector<2x32xf32>
    %cst_8 = arith.constant dense<0.000000e+00> : vector<2xf32>
    %18 = vector.multi_reduction <add>, %17, %cst_8 [1] : vector<2x32xf32> to vector<2xf32>
    %19 = vector.shape_cast %18 : vector<2xf32> to vector<2x1xf32>
    %cst_9 = arith.constant 3.200000e+01 : f32
    %20 = vector.broadcast %cst_9 : f32 to vector<2x1xf32>
    %21 = arith.divf %19, %20 : vector<2x1xf32>
    %22 = vector.broadcast %21 : vector<2x1xf32> to vector<2x32xf32>
    %23 = arith.subf %17, %22 : vector<2x32xf32>
    %24 = arith.mulf %23, %23 : vector<2x32xf32>
    %cst_10 = arith.constant dense<0.000000e+00> : vector<2xf32>
    %25 = vector.multi_reduction <add>, %24, %cst_10 [1] : vector<2x32xf32> to vector<2xf32>
    %26 = vector.shape_cast %25 : vector<2xf32> to vector<2x1xf32>
    %cst_11 = arith.constant 3.200000e+01 : f32
    %27 = vector.broadcast %cst_11 : f32 to vector<2x1xf32>
    %28 = arith.divf %26, %27 : vector<2x1xf32>
    %29 = vector.broadcast %21 : vector<2x1xf32> to vector<2x32xf32>
    %30 = arith.subf %17, %29 : vector<2x32xf32>
    %cst_12 = arith.constant 9.99999974E-6 : f32
    %31 = vector.broadcast %cst_12 : f32 to vector<2x1xf32>
    %32 = arith.addf %28, %31 : vector<2x1xf32>
    %33 = math.rsqrt %32 : vector<2x1xf32>
    %34 = vector.broadcast %33 : vector<2x1xf32> to vector<2x32xf32>
    %35 = arith.mulf %30, %34 : vector<2x32xf32>
    %36 = vector.broadcast %7 : vector<1x32xf32> to vector<2x32xf32>
    %37 = arith.mulf %35, %36 : vector<2x32xf32>
    %38 = vector.broadcast %8 : vector<1x32xf32> to vector<2x32xf32>
    %39 = arith.addf %37, %38 : vector<2x32xf32>
    %40 = arith.truncf %39 : vector<2x32xf32> to vector<2x32xbf16>
    %c0_13 = arith.constant 0 : index
    %c0_14 = arith.constant 0 : index
    %c0_15 = arith.constant 0 : index
    %41 = vector.load %arg4[%c0_13, %c0_14, %c0_15] : memref<1x32x2048xbf16, #tpu.memory_space<vmem>>, vector<1x32x2048xbf16>
    %42 = vector.shape_cast %41 : vector<1x32x2048xbf16> to vector<32x2048xbf16>
    %cst_16 = arith.constant dense<0.000000e+00> : vector<2x2048xf32>
    %43 = tpu.matmul %40, %42, %cst_16 {dimension_numbers = #tpu.dot_dimension_numbers<[1], [0], [0], [1], [0, 0, 1, 1], [], []>} : vector<2x32xbf16>, vector<32x2048xbf16>, vector<2x2048xf32> -> vector<2x2048xf32>
    %c0_17 = arith.constant 0 : index
    %c0_18 = arith.constant 0 : index
    %c0_19 = arith.constant 0 : index
    %44 = vector.load %arg5[%c0_17, %c0_18, %c0_19] : memref<1x1x2048xbf16, #tpu.memory_space<vmem>>, vector<1x1x2048xbf16>
    %45 = vector.shape_cast %44 : vector<1x1x2048xbf16> to vector<1x2048xbf16>
    %46 = arith.extf %45 : vector<1x2048xbf16> to vector<1x2048xf32>
    %47 = vector.broadcast %46 : vector<1x2048xf32> to vector<2x2048xf32>
    %48 = arith.addf %43, %47 : vector<2x2048xf32>
    %cst_20 = arith.constant 0.000000e+00 : f32
    %49 = vector.broadcast %cst_20 : f32 to vector<2x2048xf32>
    %50 = arith.maximumf %48, %49 : vector<2x2048xf32>
    %51 = arith.truncf %50 : vector<2x2048xf32> to vector<2x2048xbf16>
    %c0_21 = arith.constant 0 : index
    %c0_22 = arith.constant 0 : index
    %c0_23 = arith.constant 0 : index
    %52 = vector.load %arg6[%c0_21, %c0_22, %c0_23] : memref<1x2048x32xbf16, #tpu.memory_space<vmem>>, vector<1x2048x32xbf16>
    %53 = vector.shape_cast %52 : vector<1x2048x32xbf16> to vector<2048x32xbf16>
    %cst_24 = arith.constant dense<0.000000e+00> : vector<2x32xf32>
    %54 = tpu.matmul %51, %53, %cst_24 {dimension_numbers = #tpu.dot_dimension_numbers<[1], [0], [0], [1], [0, 0, 1, 1], [], []>} : vector<2x2048xbf16>, vector<2048x32xbf16>, vector<2x32xf32> -> vector<2x32xf32>
    %55 = vector.broadcast %11 : vector<1x32xf32> to vector<2x32xf32>
    %56 = arith.addf %54, %55 : vector<2x32xf32>
    %57 = arith.addf %39, %56 : vector<2x32xf32>
    %cst_25 = arith.constant dense<0.000000e+00> : vector<2xf32>
    %58 = vector.multi_reduction <add>, %57, %cst_25 [1] : vector<2x32xf32> to vector<2xf32>
    %59 = vector.shape_cast %58 : vector<2xf32> to vector<2x1xf32>
    %cst_26 = arith.constant 3.200000e+01 : f32
    %60 = vector.broadcast %cst_26 : f32 to vector<2x1xf32>
    %61 = arith.divf %59, %60 : vector<2x1xf32>
    %62 = vector.broadcast %61 : vector<2x1xf32> to vector<2x32xf32>
    %63 = arith.subf %57, %62 : vector<2x32xf32>
    %64 = arith.mulf %63, %63 : vector<2x32xf32>
    %cst_27 = arith.constant dense<0.000000e+00> : vector<2xf32>
    %65 = vector.multi_reduction <add>, %64, %cst_27 [1] : vector<2x32xf32> to vector<2xf32>
    %66 = vector.shape_cast %65 : vector<2xf32> to vector<2x1xf32>
    %cst_28 = arith.constant 3.200000e+01 : f32
    %67 = vector.broadcast %cst_28 : f32 to vector<2x1xf32>
    %68 = arith.divf %66, %67 : vector<2x1xf32>
    %69 = vector.broadcast %61 : vector<2x1xf32> to vector<2x32xf32>
    %70 = arith.subf %57, %69 : vector<2x32xf32>
    %cst_29 = arith.constant 9.99999974E-6 : f32
    %71 = vector.broadcast %cst_29 : f32 to vector<2x1xf32>
    %72 = arith.addf %68, %71 : vector<2x1xf32>
    %73 = math.rsqrt %72 : vector<2x1xf32>
    %74 = vector.broadcast %73 : vector<2x1xf32> to vector<2x32xf32>
    %75 = arith.mulf %70, %74 : vector<2x32xf32>
    %76 = vector.broadcast %9 : vector<1x32xf32> to vector<2x32xf32>
    %77 = arith.mulf %75, %76 : vector<2x32xf32>
    %78 = vector.broadcast %10 : vector<1x32xf32> to vector<2x32xf32>
    %79 = arith.addf %77, %78 : vector<2x32xf32>
    %c0_30 = arith.constant 0 : index
    %c0_31 = arith.constant 0 : index
    %80 = vector.load %arg13[%c0_30, %c0_31] : memref<2x32xf32, #tpu.memory_space<vmem>>, vector<2x32xf32>
    tpu.vector_store %arg13[%c0_30, %c0_31], %79 {strides = array<i32>} : memref<2x32xf32, #tpu.memory_space<vmem>>, vector<2x32xf32>,
    %c1_i32 = arith.constant 1 : i32
    %81 = arith.cmpi eq, %arg0, %c1_i32 : i32
    %82 = arith.extui %81 : i1 to i32
    %c0_i32_32 = arith.constant 0 : i32
    %83 = arith.cmpi ne, %82, %c0_i32_32 : i32
    scf.if %83 {
      %c0_33 = arith.constant 0 : index
      %c0_34 = arith.constant 0 : index
      %84 = vector.load %arg13[%c0_33, %c0_34] : memref<2x32xf32, #tpu.memory_space<vmem>>, vector<2x32xf32>
      %c0_35 = arith.constant 0 : index
      %c0_36 = arith.constant 0 : index
      %c0_37 = arith.constant 0 : index
      %85 = vector.load %arg9[%c0_35, %c0_36, %c0_37] : memref<2x3x32xf32, #tpu.memory_space<vmem>>, vector<1x3x32xf32>
      %86 = vector.shape_cast %85 : vector<1x3x32xf32> to vector<3x32xf32>
      %c0_38 = arith.constant 0 : index
      %c0_39 = arith.constant 0 : index
      %c0_40 = arith.constant 0 : index
      %87 = vector.load %arg8[%c0_38, %c0_39, %c0_40] : memref<2x32x32xf32, #tpu.memory_space<vmem>>, vector<1x32x32xf32>
      %88 = vector.shape_cast %87 : vector<1x32x32xf32> to vector<32x32xf32>
      %cst_41 = arith.constant dense<0.000000e+00> : vector<2x32xf32>
      %89 = tpu.matmul %84, %88, %cst_41 {dimension_numbers = #tpu.dot_dimension_numbers<[1], [0], [0], [1], [0, 0, 1, 1], [], []>} : vector<2x32xf32>, vector<32x32xf32>, vector<2x32xf32> -> vector<2x32xf32>
      %90 = vector.extract_strided_slice %86 {offsets = [0, 0], sizes = [1, 32], strides = [1, 1]} : vector<3x32xf32> to vector<1x32xf32>
      %91 = vector.broadcast %90 : vector<1x32xf32> to vector<2x32xf32>
      %92 = arith.addf %89, %91 : vector<2x32xf32>
      %cst_42 = arith.constant 0.000000e+00 : f32
      %93 = vector.broadcast %cst_42 : f32 to vector<2x32xf32>
      %94 = arith.maximumf %92, %93 : vector<2x32xf32>
      %95 = vector.extract_strided_slice %86 {offsets = [1, 0], sizes = [1, 32], strides = [1, 1]} : vector<3x32xf32> to vector<1x32xf32>
      %96 = vector.extract_strided_slice %86 {offsets = [2, 0], sizes = [1, 32], strides = [1, 1]} : vector<3x32xf32> to vector<1x32xf32>
      %cst_43 = arith.constant dense<0.000000e+00> : vector<2xf32>
      %97 = vector.multi_reduction <add>, %94, %cst_43 [1] : vector<2x32xf32> to vector<2xf32>
      %98 = vector.shape_cast %97 : vector<2xf32> to vector<2x1xf32>
      %cst_44 = arith.constant 3.200000e+01 : f32
      %99 = vector.broadcast %cst_44 : f32 to vector<2x1xf32>
      %100 = arith.divf %98, %99 : vector<2x1xf32>
      %101 = vector.broadcast %100 : vector<2x1xf32> to vector<2x32xf32>
      %102 = arith.subf %94, %101 : vector<2x32xf32>
      %103 = arith.mulf %102, %102 : vector<2x32xf32>
      %cst_45 = arith.constant dense<0.000000e+00> : vector<2xf32>
      %104 = vector.multi_reduction <add>, %103, %cst_45 [1] : vector<2x32xf32> to vector<2xf32>
      %105 = vector.shape_cast %104 : vector<2xf32> to vector<2x1xf32>
      %cst_46 = arith.constant 3.200000e+01 : f32
      %106 = vector.broadcast %cst_46 : f32 to vector<2x1xf32>
      %107 = arith.divf %105, %106 : vector<2x1xf32>
      %108 = vector.broadcast %100 : vector<2x1xf32> to vector<2x32xf32>
      %109 = arith.subf %94, %108 : vector<2x32xf32>
      %cst_47 = arith.constant 9.99999974E-6 : f32
      %110 = vector.broadcast %cst_47 : f32 to vector<2x1xf32>
      %111 = arith.addf %107, %110 : vector<2x1xf32>
      %112 = math.rsqrt %111 : vector<2x1xf32>
      %113 = vector.broadcast %112 : vector<2x1xf32> to vector<2x32xf32>
      %114 = arith.mulf %109, %113 : vector<2x32xf32>
      %115 = vector.broadcast %95 : vector<1x32xf32> to vector<2x32xf32>
      %116 = arith.mulf %114, %115 : vector<2x32xf32>
      %117 = vector.broadcast %96 : vector<1x32xf32> to vector<2x32xf32>
      %118 = arith.addf %116, %117 : vector<2x32xf32>
      %c1 = arith.constant 1 : index
      %c0_48 = arith.constant 0 : index
      %c0_49 = arith.constant 0 : index
      %119 = vector.load %arg9[%c1, %c0_48, %c0_49] : memref<2x3x32xf32, #tpu.memory_space<vmem>>, vector<1x3x32xf32>
      %120 = vector.shape_cast %119 : vector<1x3x32xf32> to vector<3x32xf32>
      %c1_50 = arith.constant 1 : index
      %c0_51 = arith.constant 0 : index
      %c0_52 = arith.constant 0 : index
      %121 = vector.load %arg8[%c1_50, %c0_51, %c0_52] : memref<2x32x32xf32, #tpu.memory_space<vmem>>, vector<1x32x32xf32>
      %122 = vector.shape_cast %121 : vector<1x32x32xf32> to vector<32x32xf32>
      %cst_53 = arith.constant dense<0.000000e+00> : vector<2x32xf32>
      %123 = tpu.matmul %118, %122, %cst_53 {dimension_numbers = #tpu.dot_dimension_numbers<[1], [0], [0], [1], [0, 0, 1, 1], [], []>} : vector<2x32xf32>, vector<32x32xf32>, vector<2x32xf32> -> vector<2x32xf32>
      %124 = vector.extract_strided_slice %120 {offsets = [0, 0], sizes = [1, 32], strides = [1, 1]} : vector<3x32xf32> to vector<1x32xf32>
      %125 = vector.broadcast %124 : vector<1x32xf32> to vector<2x32xf32>
      %126 = arith.addf %123, %125 : vector<2x32xf32>
      %cst_54 = arith.constant 0.000000e+00 : f32
      %127 = vector.broadcast %cst_54 : f32 to vector<2x32xf32>
      %128 = arith.maximumf %126, %127 : vector<2x32xf32>
      %129 = vector.extract_strided_slice %120 {offsets = [1, 0], sizes = [1, 32], strides = [1, 1]} : vector<3x32xf32> to vector<1x32xf32>
      %130 = vector.extract_strided_slice %120 {offsets = [2, 0], sizes = [1, 32], strides = [1, 1]} : vector<3x32xf32> to vector<1x32xf32>
      %cst_55 = arith.constant dense<0.000000e+00> : vector<2xf32>
      %131 = vector.multi_reduction <add>, %128, %cst_55 [1] : vector<2x32xf32> to vector<2xf32>
      %132 = vector.shape_cast %131 : vector<2xf32> to vector<2x1xf32>
      %cst_56 = arith.constant 3.200000e+01 : f32
      %133 = vector.broadcast %cst_56 : f32 to vector<2x1xf32>
      %134 = arith.divf %132, %133 : vector<2x1xf32>
      %135 = vector.broadcast %134 : vector<2x1xf32> to vector<2x32xf32>
      %136 = arith.subf %128, %135 : vector<2x32xf32>
      %137 = arith.mulf %136, %136 : vector<2x32xf32>
      %cst_57 = arith.constant dense<0.000000e+00> : vector<2xf32>
      %138 = vector.multi_reduction <add>, %137, %cst_57 [1] : vector<2x32xf32> to vector<2xf32>
      %139 = vector.shape_cast %138 : vector<2xf32> to vector<2x1xf32>
      %cst_58 = arith.constant 3.200000e+01 : f32
      %140 = vector.broadcast %cst_58 : f32 to vector<2x1xf32>
      %141 = arith.divf %139, %140 : vector<2x1xf32>
      %142 = vector.broadcast %134 : vector<2x1xf32> to vector<2x32xf32>
      %143 = arith.subf %128, %142 : vector<2x32xf32>
      %cst_59 = arith.constant 9.99999974E-6 : f32
      %144 = vector.broadcast %cst_59 : f32 to vector<2x1xf32>
      %145 = arith.addf %141, %144 : vector<2x1xf32>
      %146 = math.rsqrt %145 : vector<2x1xf32>
      %147 = vector.broadcast %146 : vector<2x1xf32> to vector<2x32xf32>
      %148 = arith.mulf %143, %147 : vector<2x32xf32>
      %149 = vector.broadcast %129 : vector<1x32xf32> to vector<2x32xf32>
      %150 = arith.mulf %148, %149 : vector<2x32xf32>
      %151 = vector.broadcast %130 : vector<1x32xf32> to vector<2x32xf32>
      %152 = arith.addf %150, %151 : vector<2x32xf32>
      %c1_60 = arith.constant 1 : index
      %c0_61 = arith.constant 0 : index
      %153 = vector.load %arg11[%c1_60, %c0_61] : memref<2x128xf32, #tpu.memory_space<vmem>>, vector<1x128xf32>
      %c0_62 = arith.constant 0 : index
      %c0_63 = arith.constant 0 : index
      %154 = vector.load %arg10[%c0_62, %c0_63] : memref<32x128xf32, #tpu.memory_space<vmem>>, vector<32x128xf32>
      %cst_64 = arith.constant dense<0.000000e+00> : vector<2x128xf32>
      %155 = tpu.matmul %152, %154, %cst_64 {dimension_numbers = #tpu.dot_dimension_numbers<[1], [0], [0], [1], [0, 0, 1, 1], [], []>} : vector<2x32xf32>, vector<32x128xf32>, vector<2x128xf32> -> vector<2x128xf32>
      %156 = vector.broadcast %153 : vector<1x128xf32> to vector<2x128xf32>
      %157 = arith.addf %155, %156 : vector<2x128xf32>
      %c0_65 = arith.constant 0 : index
      %c0_66 = arith.constant 0 : index
      %158 = vector.load %arg12[%c0_65, %c0_66] : memref<2x128xf32, #tpu.memory_space<vmem>>, vector<2x128xf32>
      tpu.vector_store %arg12[%c0_65, %c0_66], %157 {strides = array<i32>} : memref<2x128xf32, #tpu.memory_space<vmem>>, vector<2x128xf32>,
    } else {
    }
    return
  }
  func.func @transform_0(%arg0: i32) -> (i32, i32) {
    %c0_i32 = arith.constant 0 : i32
    %c0_i32_0 = arith.constant 0 : i32
    %c0_i32_1 = arith.constant 0 : i32
    return %c0_i32, %c0_i32_0 : i32, i32
  }
  func.func @transform_1(%arg0: i32) -> (i32, i32) {
    %c0_i32 = arith.constant 0 : i32
    %c0_i32_0 = arith.constant 0 : i32
    %c0_i32_1 = arith.constant 0 : i32
    return %c0_i32, %c0_i32_0 : i32, i32
  }
  func.func @transform_2(%arg0: i32) -> (i32, i32, i32) {
    %c0_i32 = arith.constant 0 : i32
    %c0_i32_0 = arith.constant 0 : i32
    %c0_i32_1 = arith.constant 0 : i32
    return %arg0, %c0_i32, %c0_i32_0 : i32, i32, i32
  }
  func.func @transform_3(%arg0: i32) -> (i32, i32, i32) {
    %c0_i32 = arith.constant 0 : i32
    %c0_i32_0 = arith.constant 0 : i32
    %c0_i32_1 = arith.constant 0 : i32
    return %arg0, %c0_i32, %c0_i32_0 : i32, i32, i32
  }
  func.func @transform_4(%arg0: i32) -> (i32, i32, i32) {
    %c0_i32 = arith.constant 0 : i32
    %c0_i32_0 = arith.constant 0 : i32
    %c0_i32_1 = arith.constant 0 : i32
    return %arg0, %c0_i32, %c0_i32_0 : i32, i32, i32
  }
  func.func @transform_5(%arg0: i32) -> (i32, i32, i32) {
    %c0_i32 = arith.constant 0 : i32
    %c0_i32_0 = arith.constant 0 : i32
    %c0_i32_1 = arith.constant 0 : i32
    return %arg0, %c0_i32, %c0_i32_0 : i32, i32, i32
  }
  func.func @transform_6(%arg0: i32) -> (i32, i32, i32) {
    %c0_i32 = arith.constant 0 : i32
    %c0_i32_0 = arith.constant 0 : i32
    %c0_i32_1 = arith.constant 0 : i32
    return %arg0, %c0_i32, %c0_i32_0 : i32, i32, i32
  }
  func.func @transform_7(%arg0: i32) -> (i32, i32, i32) {
    %c0_i32 = arith.constant 0 : i32
    %c0_i32_0 = arith.constant 0 : i32
    %c0_i32_1 = arith.constant 0 : i32
    %c0_i32_2 = arith.constant 0 : i32
    return %c0_i32, %c0_i32_0, %c0_i32_1 : i32, i32, i32
  }
  func.func @transform_8(%arg0: i32) -> (i32, i32, i32) {
    %c0_i32 = arith.constant 0 : i32
    %c0_i32_0 = arith.constant 0 : i32
    %c0_i32_1 = arith.constant 0 : i32
    %c0_i32_2 = arith.constant 0 : i32
    return %c0_i32, %c0_i32_0, %c0_i32_1 : i32, i32, i32
  }
  func.func @transform_9(%arg0: i32) -> (i32, i32) {
    %c0_i32 = arith.constant 0 : i32
    %c0_i32_0 = arith.constant 0 : i32
    %c0_i32_1 = arith.constant 0 : i32
    return %c0_i32, %c0_i32_0 : i32, i32
  }
  func.func @transform_10(%arg0: i32) -> (i32, i32) {
    %c0_i32 = arith.constant 0 : i32
    %c0_i32_0 = arith.constant 0 : i32
    %c0_i32_1 = arith.constant 0 : i32
    return %c0_i32, %c0_i32_0 : i32, i32
  }
  func.func @transform_11(%arg0: i32) -> (i32, i32) {
    %c0_i32 = arith.constant 0 : i32
    %c0_i32_0 = arith.constant 0 : i32
    %c0_i32_1 = arith.constant 0 : i32
    return %c0_i32, %c0_i32_0 : i32, i32
  }
}

</mosaic_0001>

<bundles_post_ra>
// kernel: transformer_with_mlp.1
= control target key start
LH: loop header
LB: loop body
LE: loop exit
PB: predicated region body
PF: predicated region fallthrough
CT: control target
= control target key end

     0   :  { %s5039_s0 = inlined_call_operand.vmem [shape: f32[2,1024], index: 0, kind: input, shape index: {}]   ;;  %s5040_s1 = inlined_call_operand.vmem [shape: bf16[1024,32], index: 1, kind: input, shape index: {}]   ;;  %s5041_s2 = inlined_call_operand.vmem [shape: f32[2,32,32], index: 2, kind: input, shape index: {}]   ;;  %s5042_s3 = inlined_call_operand.vmem [shape: bf16[2,32,2048], index: 3, kind: input, shape index: {}]   ;;  %s5043_s4 = inlined_call_operand.vmem [shape: bf16[2,1,2048], index: 4, kind: input, shape index: {}]   ;;  %s5044_s5 = inlined_call_operand.vmem [shape: bf16[2,2048,32], index: 5, kind: input, shape index: {}]   ;;  %s5045_s6 = inlined_call_operand.vmem [shape: f32[2,6,32], index: 6, kind: input, shape index: {}]   ;;  %s5046_s7 = inlined_call_operand.vmem [shape: f32[2,32,32], index: 7, kind: input, shape index: {}]   ;;  %s5047_s8 = inlined_call_operand.vmem [shape: f32[2,3,32], index: 8, kind: input, shape index: {}]   ;;  %s5048_s9 = inlined_call_operand.vmem [shape: f32[32,128], index: 9, kind: input, shape index: {}]   ;;  %s5049_s10 = inlined_call_operand.vmem [shape: f32[2,128], index: 10, kind: input, shape index: {}]   ;;  %s5050_s11 = inlined_call_operand.hbm [shape: f32[2,128], index: 11, kind: output, shape index: {}]  }
   0x1   :  { %5051 = sst [smem:[#allocation6_spill]] %s5041_s2 }
   0x2   :  { %16 = vsyncpa [#allocation4], 0  ;;  %s4466_s17 = smov 0  }
   0x3 LB: > { %s4472_s18 = sadd.s32 4294967295, %s4402_s17   ;;  %p3172_p0 = scmp.ge.s32.totalorder %s4402_s17, 1  ;;  %s4402_s17 = sphi %s4466_s17, %s22_s17  }
   0x4   : > { %p371_p1 = scmp.lt.s32.totalorder %s4402_s17, 3 }
   0x6   : > { %p372_p2 = pnand %p3172_p0, %p371_p1 }
   0x7   : > { %p424_p3 = scmp.lt.s32.totalorder (!%p372_p2), %s4472_s18, 1  ;;  %s5052_s2 = sld [smem:[#allocation6_spill]] (!%p372_p2) }
   0x8   : > { %375 = sbr.rel (%p372_p2) target bundleno = 2194 (0x892), region = 64  ;;  %p3181_p4 = scmp.ne.s32.totalorder (!%p372_p2), %s4472_s18, 0 }
   0xd   : > { %s425_s19 = scalar_select %p424_p3, %s4472_s18, 1 }
   0xf   : > { %s4108_s20 = sshll.u32 %s425_s19, 5  ;;  %s4109_s21 = sshll.u32 %s425_s19, 8 }
  0x10   : > { %s4481_s24 = scalar_lea.vmem %s5052_s2, %s4108_s20  ;;  %s4486_s27 = scalar_lea.vmem %s5042_s3, %s4109_s21 }
  0x11   : > { %s3177_s28 = sshll.u32 %s425_s19, 4  ;;  %s4110_s29 = sshll.u32 %s425_s19, 10 }
  0x12   : > { %s4491_s13 = scalar_lea.vmem %s5043_s4, %s3177_s28  ;;  %s4496_s16 = scalar_lea.vmem %s5044_s5, %s4110_s29 }
  0x13   : > { %s3180_s22 = sshll.u32 %s425_s19, 3  ;;  %451 = sbr.rel (%p3181_p4) target bundleno = 231 (0xe7), region = 68 }
  0x14   : > { %s4501_s2 = scalar_lea.vmem %s5045_s6, %s3180_s22 }
  0x18   : > { %v4118_v0 = vld [vmem:[%s5040_s1 + $0x38] sm:$0xff]  ;;  %v4117_v4 = vld [vmem:[%s5040_s1 + $0x30] sm:$0xff]  ;;  %v4116_v8 = vld [vmem:[%s5040_s1 + $0x28] sm:$0xff]  ;;  %vm1101_vm0 = vcmask 254976  }
  0x19   : > { %v4126_v1 = vld [vmem:[%s5040_s1 + $0x78] sm:$0xff]  ;;  %997 = vmatpush.bf16.msra.mxu0 %v4118_v0  ;;  %v4125_v5 = vld [vmem:[%s5040_s1 + $0x70] sm:$0xff]  ;;  %v4124_v9 = vld [vmem:[%s5040_s1 + $0x68] sm:$0xff] }
  0x1a   : > { %v4134_v2 = vld [vmem:[%s5040_s1 + $0xb8] sm:$0xff]  ;;  %1010 = vmatpush.bf16.msra.mxu1 %v4126_v1  ;;  %v4133_v6 = vld [vmem:[%s5040_s1 + $0xb0] sm:$0xff]  ;;  %v4132_v10 = vld [vmem:[%s5040_s1 + $0xa8] sm:$0xff] }
  0x1b   : > { %v4142_v3 = vld [vmem:[%s5040_s1 + $0xf8] sm:$0xff]  ;;  %1023 = vmatpush.bf16.msra.mxu2 %v4134_v2  ;;  %v4141_v7 = vld [vmem:[%s5040_s1 + $0xf0] sm:$0xff]  ;;  %v4140_v11 = vld [vmem:[%s5040_s1 + $0xe8] sm:$0xff] }
  0x1c   : > { %1036 = vmatpush.bf16.msra.mxu3 %v4142_v3  ;;  %v4115_v12 = vld [vmem:[%s5040_s1 + $0x20] sm:$0xff]  ;;  %v4114_v17 = vld [vmem:[%s5040_s1 + $0x18] sm:$0xff]  ;;  %v4113_v21 = vld [vmem:[%s5040_s1 + $0x10] sm:$0xff] }
  0x1d   : > { %998 = vmatpush.bf16.msra.mxu0 %v4117_v4  ;;  %v4123_v13 = vld [vmem:[%s5040_s1 + $0x60] sm:$0xff]  ;;  %v4122_v18 = vld [vmem:[%s5040_s1 + $0x58] sm:$0xff]  ;;  %v4121_v22 = vld [vmem:[%s5040_s1 + $0x50] sm:$0xff] }
  0x1e   : > { %1011 = vmatpush.bf16.msra.mxu1 %v4125_v5  ;;  %v4131_v14 = vld [vmem:[%s5040_s1 + $0xa0] sm:$0xff]  ;;  %v4130_v19 = vld [vmem:[%s5040_s1 + $0x98] sm:$0xff]  ;;  %v4129_v23 = vld [vmem:[%s5040_s1 + $0x90] sm:$0xff] }
  0x1f   : > { %1024 = vmatpush.bf16.msra.mxu2 %v4133_v6  ;;  %v4139_v15 = vld [vmem:[%s5040_s1 + $0xe0] sm:$0xff]  ;;  %v4138_v20 = vld [vmem:[%s5040_s1 + $0xd8] sm:$0xff]  ;;  %v4137_v24 = vld [vmem:[%s5040_s1 + $0xd0] sm:$0xff] }
  0x20   : > { %1037 = vmatpush.bf16.msra.mxu3 %v4141_v7  ;;  %v452_v16 = vld [vmem:[%s5039_s0] sm:$0xff]  ;;  %v4112_v25 = vld [vmem:[%s5040_s1 + $0x8] sm:$0xff]  ;;  %v4150_v34 = vld [vmem:[%s5040_s1 + $0x138] sm:$0xff] }
  0x21   : > { %999 = vmatpush.bf16.msra.mxu0 %v4116_v8  ;;  %456 = vst [vmem:[#allocation1] ss:$4 sm:$0xff] %v452_v16  ;;  %v4120_v26 = vld [vmem:[%s5040_s1 + $0x48] sm:$0xff]  ;;  %v4111_v30 = vld [vmem:[%s5040_s1] sm:$0xff]  ;;  %v4158_v35 = vld [vmem:[%s5040_s1 + $0x178] sm:$0xff] }
  0x22   : > { %1012 = vmatpush.bf16.msra.mxu1 %v4124_v9  ;;  %v4128_v27 = vld [vmem:[%s5040_s1 + $0x88] sm:$0xff]  ;;  %v4119_v31 = vld [vmem:[%s5040_s1 + $0x40] sm:$0xff]  ;;  %v4166_v40 = vld [vmem:[%s5040_s1 + $0x1b8] sm:$0xff] }
  0x23   : > { %1025 = vmatpush.bf16.msra.mxu2 %v4132_v10  ;;  %v4136_v28 = vld [vmem:[%s5040_s1 + $0xc8] sm:$0xff]  ;;  %v4127_v32 = vld [vmem:[%s5040_s1 + $0x80] sm:$0xff]  ;;  %v4174_v41 = vld [vmem:[%s5040_s1 + $0x1f8] sm:$0xff] }
  0x24   : > { %1038 = vmatpush.bf16.msra.mxu3 %v4140_v11  ;;  %v453_v29 = vld [vmem:[%s5039_s0 + $0x8] sm:$0xff]  ;;  %v4135_v33 = vld [vmem:[%s5040_s1 + $0xc0] sm:$0xff]  ;;  %v4149_v46 = vld [vmem:[%s5040_s1 + $0x130] sm:$0xff] }
  0x25   : > { %1000 = vmatpush.bf16.msra.mxu0 %v4115_v12  ;;  %458 = vst [vmem:[#allocation1 + $0x20] ss:$4 sm:$0xff] %v453_v29  ;;  %v4157_v47 = vld [vmem:[%s5040_s1 + $0x170] sm:$0xff]  ;;  %v4148_v50 = vld [vmem:[%s5040_s1 + $0x128] sm:$0xff]  ;;  %v4147_v54 = vld [vmem:[%s5040_s1 + $0x120] sm:$0xff] }
  0x26   : > { %1013 = vmatpush.bf16.msra.mxu1 %v4123_v13  ;;  %v4165_v48 = vld [vmem:[%s5040_s1 + $0x1b0] sm:$0xff]  ;;  %v4156_v51 = vld [vmem:[%s5040_s1 + $0x168] sm:$0xff]  ;;  %v4155_v55 = vld [vmem:[%s5040_s1 + $0x160] sm:$0xff] }
  0x27   : > { %1026 = vmatpush.bf16.msra.mxu2 %v4131_v14  ;;  %v4173_v49 = vld [vmem:[%s5040_s1 + $0x1f0] sm:$0xff]  ;;  %v4164_v52 = vld [vmem:[%s5040_s1 + $0x1a8] sm:$0xff]  ;;  %v4163_v56 = vld [vmem:[%s5040_s1 + $0x1a0] sm:$0xff] }
  0x28   : > { %1039 = vmatpush.bf16.msra.mxu3 %v4139_v15  ;;  %v461_v36 = vld.sshfl [vmem:[#allocation1 + $0x10] sm:$0xff pattern:$0x73625140]  ;;  %v462_v37 = vld.sshfl [vmem:[#allocation1 + $0x18] sm:$0xff pattern:$0x73625140] }
  0x29   : > { %1001 = vmatpush.bf16.msra.mxu0 %v4114_v17  ;;  %v459_v38 = vld.sshfl [vmem:[#allocation1] sm:$0xff pattern:$0x73625140]  ;;  %v460_v39 = vld.sshfl [vmem:[#allocation1 + $0x8] sm:$0xff pattern:$0x73625140]  ;;  %v477_v42 = vpack.c.bf16 %v461_v36, %v461_v36  ;;  %v478_v43 = vpack.c.bf16 %v462_v37, %v462_v37 }
  0x2a   : > { %1014 = vmatpush.bf16.msra.mxu1 %v4122_v18  ;;  %v475_v44 = vpack.c.bf16 %v459_v38, %v459_v38  ;;  %v476_v45 = vpack.c.bf16 %v460_v39, %v460_v39  ;;  %v4172_v53 = vld [vmem:[%s5040_s1 + $0x1e8] sm:$0xff]  ;;  %v4171_v57 = vld [vmem:[%s5040_s1 + $0x1e0] sm:$0xff]  ;;  %v4146_v58 = vld [vmem:[%s5040_s1 + $0x118] sm:$0xff] }
  0x2b   : > { %1027 = vmatpush.bf16.msra.mxu2 %v4130_v19  ;;  %v4154_v59 = vld [vmem:[%s5040_s1 + $0x158] sm:$0xff]  ;;  %v4145_v62 = vld [vmem:[%s5040_s1 + $0x110] sm:$0xff]  ;;  %v4144_v2 = vld [vmem:[%s5040_s1 + $0x108] sm:$0xff] }
  0x2c   : > { %1040 = vmatpush.bf16.msra.mxu3 %v4138_v20  ;;  %v4162_v60 = vld [vmem:[%s5040_s1 + $0x198] sm:$0xff]  ;;  %v4153_v63 = vld [vmem:[%s5040_s1 + $0x150] sm:$0xff]  ;;  %v4152_v3 = vld [vmem:[%s5040_s1 + $0x148] sm:$0xff] }
  0x2d   : > { %1002 = vmatpush.bf16.msra.mxu0 %v4113_v21  ;;  %v4170_v61 = vld [vmem:[%s5040_s1 + $0x1d8] sm:$0xff]  ;;  %v4161_v0 = vld [vmem:[%s5040_s1 + $0x190] sm:$0xff]  ;;  %v4160_v4 = vld [vmem:[%s5040_s1 + $0x188] sm:$0xff] }
  0x2e   : > { %1015 = vmatpush.bf16.msra.mxu1 %v4121_v22  ;;  %v4169_v1 = vld [vmem:[%s5040_s1 + $0x1d0] sm:$0xff]  ;;  %v4168_v5 = vld [vmem:[%s5040_s1 + $0x1c8] sm:$0xff]  ;;  %v4143_v6 = vld [vmem:[%s5040_s1 + $0x100] sm:$0xff] }
  0x2f   : > { %1028 = vmatpush.bf16.msra.mxu2 %v4129_v23  ;;  %v4151_v7 = vld [vmem:[%s5040_s1 + $0x140] sm:$0xff]  ;;  %v464_v11 = vld.sshfl [vmem:[#allocation1 + $0x28] sm:$0xff pattern:$0x73625140] }
  0x30   : > { %1041 = vmatpush.bf16.msra.mxu3 %v4137_v24  ;;  %v4159_v8 = vld [vmem:[%s5040_s1 + $0x180] sm:$0xff]  ;;  %v465_v12 = vld.sshfl [vmem:[#allocation1 + $0x30] sm:$0xff pattern:$0x73625140]  ;;  %v480_v15 = vpack.c.bf16 %v464_v11, %v464_v11 }
  0x31   : > { %1003 = vmatpush.bf16.msra.mxu0 %v4112_v25  ;;  %v4167_v9 = vld [vmem:[%s5040_s1 + $0x1c0] sm:$0xff]  ;;  %v466_v13 = vld.sshfl [vmem:[#allocation1 + $0x38] sm:$0xff pattern:$0x73625140]  ;;  %v481_v16 = vpack.c.bf16 %v465_v12, %v465_v12 }
  0x32   : > { %1016 = vmatpush.bf16.msra.mxu1 %v4120_v26  ;;  %v463_v10 = vld.sshfl [vmem:[#allocation1 + $0x20] sm:$0xff pattern:$0x73625140]  ;;  %v482_v17 = vpack.c.bf16 %v466_v13, %v466_v13 }
  0x33   : > { %1029 = vmatpush.bf16.msra.mxu2 %v4128_v27  ;;  %v479_v14 = vpack.c.bf16 %v463_v10, %v463_v10  ;;  %v4351_v24 = vld [vmem:[%s5049_s10] ss:$0 sm:$0xff] }
  0x34   : > { %1042 = vmatpush.bf16.msra.mxu3 %v4136_v28 }
  0x35   : > { %1004 = vmatpush.bf16.msra.mxu0 %v4111_v30 }
  0x36   : > { %1017 = vmatpush.bf16.msra.mxu1 %v4119_v31 }
  0x37   : > { %1030 = vmatpush.bf16.msra.mxu2 %v4127_v32 }
  0x38   : > { %1043 = vmatpush.bf16.msra.mxu3 %v4135_v33  ;;  %1005 = vmatmul.bf16.vlgmr.msra.gmra.mxu0 %v475_v44 }
  0x39   : > { %1049 = vmatpush.bf16.msrb.mxu0 %v4150_v34  ;;  %1018 = vmatmul.bf16.vlgmr.msra.gmra.mxu1 %v476_v45 }
  0x3a   : > { %1062 = vmatpush.bf16.msrb.mxu1 %v4158_v35  ;;  %1031 = vmatmul.bf16.vlgmr.msra.gmra.mxu2 %v477_v42 }
  0x3b   : > { %1075 = vmatpush.bf16.msrb.mxu2 %v4166_v40  ;;  %1044 = vmatmul.bf16.vlgmr.msra.gmra.mxu3 %v478_v43 }
  0x3c   : > { %1088 = vmatpush.bf16.msrb.mxu3 %v4174_v41 }
  0x3d   : > { %1050 = vmatpush.bf16.msrb.mxu0 %v4149_v46 }
  0x3e   : > { %1063 = vmatpush.bf16.msrb.mxu1 %v4157_v47 }
  0x3f   : > { %1076 = vmatpush.bf16.msrb.mxu2 %v4165_v48 }
  0x40   : > { %1089 = vmatpush.bf16.msrb.mxu3 %v4173_v49 }
  0x41   : > { %1051 = vmatpush.bf16.msrb.mxu0 %v4148_v50 }
  0x42   : > { %1064 = vmatpush.bf16.msrb.mxu1 %v4156_v51 }
  0x43   : > { %1077 = vmatpush.bf16.msrb.mxu2 %v4164_v52 }
  0x44   : > { %1090 = vmatpush.bf16.msrb.mxu3 %v4172_v53 }
  0x45   : > { %1052 = vmatpush.bf16.msrb.mxu0 %v4147_v54 }
  0x46   : > { %1065 = vmatpush.bf16.msrb.mxu1 %v4155_v55 }
  0x47   : > { %1078 = vmatpush.bf16.msrb.mxu2 %v4163_v56 }
  0x48   : > { %1091 = vmatpush.bf16.msrb.mxu3 %v4171_v57 }
  0x49   : > { %1053 = vmatpush.bf16.msrb.mxu0 %v4146_v58 }
  0x4a   : > { %1066 = vmatpush.bf16.msrb.mxu1 %v4154_v59 }
  0x4b   : > { %1079 = vmatpush.bf16.msrb.mxu2 %v4162_v60 }
  0x4c   : > { %1092 = vmatpush.bf16.msrb.mxu3 %v4170_v61 }
  0x4d   : > { %1054 = vmatpush.bf16.msrb.mxu0 %v4145_v62 }
  0x4e   : > { %1067 = vmatpush.bf16.msrb.mxu1 %v4153_v63 }
  0x4f   : > { %1080 = vmatpush.bf16.msrb.mxu2 %v4161_v0 }
  0x50   : > { %1093 = vmatpush.bf16.msrb.mxu3 %v4169_v1 }
  0x51   : > { %1055 = vmatpush.bf16.msrb.mxu0 %v4144_v2 }
  0x52   : > { %1068 = vmatpush.bf16.msrb.mxu1 %v4152_v3 }
  0x53   : > { %1081 = vmatpush.bf16.msrb.mxu2 %v4160_v4 }
  0x54   : > { %1094 = vmatpush.bf16.msrb.mxu3 %v4168_v5 }
  0x55   : > { %1056 = vmatpush.bf16.msrb.mxu0 %v4143_v6 }
  0x56   : > { %1069 = vmatpush.bf16.msrb.mxu1 %v4151_v7 }
  0x57   : > { %1082 = vmatpush.bf16.msrb.mxu2 %v4159_v8 }
  0x58   : > { %1095 = vmatpush.bf16.msrb.mxu3 %v4167_v9  ;;  %1057 = vmatmul.bf16.vlgmr.msrb.gmra.mxu0 %v479_v14 }
  0x59   : > { %1070 = vmatmul.bf16.vlgmr.msrb.gmra.mxu1 %v480_v15 }
  0x5a   : > { %1083 = vmatmul.bf16.vlgmr.msrb.gmra.mxu2 %v481_v16 }
  0x5b   : > { %1096 = vmatmul.bf16.vlgmr.msrb.gmra.mxu3 %v482_v17 }
  0xb5   : > { %v1006_v18 = vpop.f32.mrf.mxu0 }
  0xb6   : > { %v1019_v19 = vpop.f32.mrf.mxu1  ;;  %v1007_v27 = vadd.f32 %v4351_v24, %v1006_v18 }
  0xb8   : > { %v1020_v28 = vadd.f32 %v1019_v19, %v1007_v27 }
  0xbd   : > { %v1032_v20 = vpop.f32.mrf.mxu2  ;;  %v1008_v22 = vpop.f32.mrf.mxu0 }
  0xbe   : > { %v1045_v21 = vpop.f32.mrf.mxu3  ;;  %v1021_v23 = vpop.f32.mrf.mxu1  ;;  %v1033_v29 = vadd.f32 %v1032_v20, %v1020_v28 }
  0xc0   : > { %v1046_v30 = vadd.f32 %v1045_v21, %v1033_v29 }
  0xc5   : > { %v1034_v25 = vpop.f32.mrf.mxu2 }
  0xc6   : > { %v1047_v26 = vpop.f32.mrf.mxu3 }
  0xd5   : > { %v1058_v31 = vpop.f32.mrf.mxu0 }
  0xd6   : > { %v1071_v32 = vpop.f32.mrf.mxu1  ;;  %v1059_v33 = vadd.f32 %v1058_v31, %v1046_v30 }
  0xd8   : > { %v1072_v34 = vadd.f32 %v1071_v32, %v1059_v33 }
  0xdd   : > { %v1084_v35 = vpop.f32.mrf.mxu2  ;;  %v1060_v38 = vpop.f32.mrf.mxu0 }
  0xde   : > { %v1097_v36 = vpop.f32.mrf.mxu3  ;;  %v1085_v37 = vadd.f32 %v1084_v35, %v1072_v34  ;;  %v1073_v39 = vpop.f32.mrf.mxu1 }
  0xe0   : > { %v1098_v40 = vadd.f32 %v1097_v36, %v1085_v37 }
  0xe2   : > { %1102 = vst.msk [vmem:[#allocation2] sm:$0x3] %vm1101_vm0, %v1098_v40 }
  0xe5   : > { %v1086_v41 = vpop.f32.mrf.mxu2 }
  0xe6   : > { %v1099_v42 = vpop.f32.mrf.mxu3 }
  0xe7 PF: > { %v1108_v43 = vld [vmem:[%s4481_s24 + $0x18] sm:$0xff]  ;;  %v1107_v44 = vld [vmem:[%s4481_s24 + $0x10] sm:$0xff]  ;;  %v1106_v45 = vld [vmem:[%s4481_s24 + $0x8] sm:$0xff]  ;;  %vm1110_vm1 = vcmask 261120   ;;  %vm1135_vm2 = vcmask 254976   ;;  %v4404_v54 = vmov 32.0  }
  0xe8   : > { %1126 = vmatpush.msra.mxu0 %v1108_v43  ;;  %v1105_v46 = vld [vmem:[%s4481_s24] sm:$0xff]  ;;  %4352 = vrcp.f32 %v4404_v54  ;;  %v3513_v7 = vld [vmem:[%s4486_s27 + $0x88] sm:$0xf]  ;;  %v4192_v11 = vld [vmem:[%s4486_s27 + $0x8c] sm:$0xf]  ;;  %p4095_p5 = scmp.ne.s32.totalorder %s4472_s18, 1 }
  0xe9   : > { %v1103_v47 = vld [vmem:[#allocation2] sm:$0x3]  ;;  %v4711_v48 = vld [vmem:[%s4501_s2] sm:$0x3f]  ;;  %v3515_v12 = vld [vmem:[%s4486_s27 + $0xc8] sm:$0xf0] }
  0xea   : > { %1127 = vmatpush.msra.mxu0 %v1107_v44  ;;  %v1109_v49 = vperm.slane %v4711_v48, 0  ;;  %v3505_v2 = vld [vmem:[%s4486_s27 + $0x80] sm:$0xf]  ;;  %v4191_v4 = vld [vmem:[%s4486_s27 + $0x84] sm:$0xf]  ;;  %v3518_v13 = vor.u32 %v4192_v11, %v3515_v12 }
  0xeb   : > { %v4199_v3 = vld [vmem:[%s4486_s27 + $0xbc] sm:$0xf0]  ;;  %v3507_v6 = vld [vmem:[%s4486_s27 + $0xc0] sm:$0xf0]  ;;  %v4200_v8 = vld [vmem:[%s4486_s27 + $0xc4] sm:$0xf0] }
  0xec   : > { %1128 = vmatpush.msra.mxu0 %v1106_v45  ;;  %v3506_v5 = vor.u32 %v4199_v3, %v3505_v2  ;;  %v3510_v9 = vor.u32 %v4191_v4, %v3507_v6  ;;  %v3514_v10 = vor.u32 %v4200_v8, %v3513_v7  ;;  %v3441_v14 = vld [vmem:[%s4486_s27] sm:$0xf]  ;;  %v4175_v16 = vld [vmem:[%s4486_s27 + $0x4] sm:$0xf]  ;;  %v3449_v19 = vld [vmem:[%s4486_s27 + $0x8] sm:$0xf] }
  0xed   : > { %v4183_v15 = vld [vmem:[%s4486_s27 + $0x3c] sm:$0xf0]  ;;  %v3443_v18 = vld [vmem:[%s4486_s27 + $0x40] sm:$0xf0]  ;;  %v4184_v20 = vld [vmem:[%s4486_s27 + $0x44] sm:$0xf0] }
  0xee   : > { %1129 = vmatpush.msra.mxu0 %v1105_v46  ;;  %v4353_v55 = vpop.eup %4352  ;;  %1429 = vmatpush.bf16.msra.mxu1 %v3506_v5  ;;  %v3442_v17 = vor.u32 %v4183_v15, %v3441_v14  ;;  %v3446_v21 = vor.u32 %v4175_v16, %v3443_v18  ;;  %v3450_v22 = vor.u32 %v4184_v20, %v3449_v19  ;;  %v4176_v23 = vld [vmem:[%s4486_s27 + $0xc] sm:$0xf]  ;;  %v3521_v27 = vld [vmem:[%s4486_s27 + $0x90] sm:$0xf]  ;;  %v4193_v29 = vld [vmem:[%s4486_s27 + $0x94] sm:$0xf] }
  0xef   : > { %3438 = vmatmul.msk.f32.vlgmr.msra.gmra.mxu0 %vm1110_vm1, %v1103_v47  ;;  %v1140_v56 = vmul.f32 32.0, %v4353_v55  ;;  %vm1144_vm3 = vweird.f32 %v4353_v55  ;;  %1442 = vmatpush.bf16.msra.mxu2 %v3510_v9  ;;  %v3451_v24 = vld [vmem:[%s4486_s27 + $0x48] sm:$0xf0]  ;;  %v4201_v28 = vld [vmem:[%s4486_s27 + $0xcc] sm:$0xf0] }
  0xf0   : > { %1455 = vmatpush.bf16.msra.mxu3 %v3514_v10  ;;  %1468 = vmatpush.bf16.msrb.mxu0 %v3518_v13  ;;  %v3454_v25 = vor.u32 %v4176_v23, %v3451_v24  ;;  %v3522_v31 = vor.u32 %v4201_v28, %v3521_v27  ;;  %v3523_v32 = vld [vmem:[%s4486_s27 + $0xd0] sm:$0xf0]  ;;  %v3529_v33 = vld [vmem:[%s4486_s27 + $0x98] sm:$0xf]  ;;  %v4194_v37 = vld [vmem:[%s4486_s27 + $0x9c] sm:$0xf] }
  0xf1   : > { %v1141_v57 = vsub.f32 1.0, %v1140_v56  ;;  %v4202_v34 = vld [vmem:[%s4486_s27 + $0xd4] sm:$0xf0]  ;;  %v3526_v35 = vor.u32 %v4193_v29, %v3523_v32  ;;  %v3531_v38 = vld [vmem:[%s4486_s27 + $0xd8] sm:$0xf0] }
  0xf2   : > { %1430 = vmatpush.bf16.msra.mxu1 %v3442_v17  ;;  %v3530_v36 = vor.u32 %v4202_v34, %v3529_v33  ;;  %v3457_v39 = vld [vmem:[%s4486_s27 + $0x10] sm:$0xf]  ;;  %v3534_v41 = vor.u32 %v4194_v37, %v3531_v38  ;;  %v4177_v43 = vld [vmem:[%s4486_s27 + $0x14] sm:$0xf]  ;;  %v3465_v46 = vld [vmem:[%s4486_s27 + $0x18] sm:$0xf] }
  0xf3   : > { %v1142_v58 = vmul.f32 %v4353_v55, %v1141_v57  ;;  %1443 = vmatpush.bf16.msra.mxu2 %v3446_v21  ;;  %v4185_v42 = vld [vmem:[%s4486_s27 + $0x4c] sm:$0xf0]  ;;  %v3459_v45 = vld [vmem:[%s4486_s27 + $0x50] sm:$0xf0]  ;;  %v3537_v3 = vld [vmem:[%s4486_s27 + $0xa0] sm:$0xf] }
  0xf4   : > { %1456 = vmatpush.bf16.msra.mxu3 %v3450_v22  ;;  %1469 = vmatpush.bf16.msrb.mxu0 %v3454_v25  ;;  %v3458_v44 = vor.u32 %v4185_v42, %v3457_v39  ;;  %v4203_v4 = vld [vmem:[%s4486_s27 + $0xdc] sm:$0xf0]  ;;  %v4195_v5 = vld [vmem:[%s4486_s27 + $0xa4] sm:$0xf]  ;;  %v3545_v7 = vld [vmem:[%s4486_s27 + $0xa8] sm:$0xf] }
  0xf5   : > { %v1143_v59 = vadd.f32 %v4353_v55, %v1142_v58  ;;  %v3539_v6 = vld [vmem:[%s4486_s27 + $0xe0] sm:$0xf0]  ;;  %v4204_v9 = vld [vmem:[%s4486_s27 + $0xe4] sm:$0xf0]  ;;  %v4196_v10 = vld [vmem:[%s4486_s27 + $0xac] sm:$0xf]  ;;  %v3538_v11 = vor.u32 %v4203_v4, %v3537_v3 }
  0xf6   : > { %1481 = vmatpush.bf16.msrb.mxu1 %v3522_v31  ;;  %v3542_v12 = vor.u32 %v4195_v5, %v3539_v6  ;;  %v3473_v13 = vld [vmem:[%s4486_s27 + $0x20] sm:$0xf]  ;;  %v3546_v15 = vor.u32 %v4204_v9, %v3545_v7  ;;  %v4179_v17 = vld [vmem:[%s4486_s27 + $0x24] sm:$0xf]  ;;  %v3481_v19 = vld [vmem:[%s4486_s27 + $0x28] sm:$0xf] }
  0xf7   : > { %v4715_v60 = vsel %vm1144_vm3, %v4353_v55, %v1143_v59  ;;  %1494 = vmatpush.bf16.msrb.mxu2 %v3526_v35  ;;  %v4187_v14 = vld [vmem:[%s4486_s27 + $0x5c] sm:$0xf0]  ;;  %v3475_v18 = vld [vmem:[%s4486_s27 + $0x60] sm:$0xf0]  ;;  %v4188_v20 = vld [vmem:[%s4486_s27 + $0x64] sm:$0xf0] }
  0xf8   : > { %1507 = vmatpush.bf16.msrb.mxu3 %v3530_v36  ;;  %1520 = vmatpush.bf16.msra.mxu0 %v3534_v41  ;;  %v4180_v21 = vld [vmem:[%s4486_s27 + $0x2c] sm:$0xf]  ;;  %v3474_v23 = vor.u32 %v4187_v14, %v3473_v13  ;;  %v3478_v24 = vor.u32 %v4179_v17, %v3475_v18  ;;  %v3482_v25 = vor.u32 %v4188_v20, %v3481_v19  ;;  %v3553_v27 = vld [vmem:[%s4486_s27 + $0xb0] sm:$0xf]  ;;  %v4197_v29 = vld [vmem:[%s4486_s27 + $0xb4] sm:$0xf] }
  0xf9   : > { %v3483_v22 = vld [vmem:[%s4486_s27 + $0x68] sm:$0xf0]  ;;  %v4205_v28 = vld [vmem:[%s4486_s27 + $0xec] sm:$0xf0]  ;;  %v3561_v31 = vld [vmem:[%s4486_s27 + $0xb8] sm:$0xf] }
  0xfa   : > { %1482 = vmatpush.bf16.msrb.mxu1 %v3458_v44  ;;  %v4206_v32 = vld [vmem:[%s4486_s27 + $0xf4] sm:$0xf0]  ;;  %v4198_v33 = vld [vmem:[%s4486_s27 + $0xbc] sm:$0xf]  ;;  %v3554_v35 = vor.u32 %v4205_v28, %v3553_v27  ;;  %v3489_v37 = vld [vmem:[%s4486_s27 + $0x30] sm:$0xf] }
  0xfb   : > { %v3563_v34 = vld [vmem:[%s4486_s27 + $0xf8] sm:$0xf0]  ;;  %v4189_v38 = vld [vmem:[%s4486_s27 + $0x6c] sm:$0xf0]  ;;  %v3562_v39 = vor.u32 %v4206_v32, %v3561_v31  ;;  %v4181_v41 = vld [vmem:[%s4486_s27 + $0x34] sm:$0xf] }
  0xfc   : > { %v3491_v42 = vld [vmem:[%s4486_s27 + $0x70] sm:$0xf0]  ;;  %v4190_v44 = vld [vmem:[%s4486_s27 + $0x74] sm:$0xf0]  ;;  %v4235_v3 = vld [vmem:[%s4496_s16 + $0xe0] sm:$0xff] }
  0xfd   : > { %v4219_v4 = vld [vmem:[%s4496_s16 + $0x60] sm:$0xff]  ;;  %v4210_v6 = vld [vmem:[%s4496_s16 + $0x18] sm:$0xff]  ;;  %v4225_v13 = vld [vmem:[%s4496_s16 + $0x90] sm:$0xff] }
  0xfe   : > { %v4227_v5 = vld [vmem:[%s4496_s16 + $0xa0] sm:$0xff]  ;;  %v4234_v7 = vld [vmem:[%s4496_s16 + $0xd8] sm:$0xff]  ;;  %v4208_v14 = vld [vmem:[%s4496_s16 + $0x8] sm:$0xff] }
  0xff   : > { %v4218_v9 = vld [vmem:[%s4496_s16 + $0x58] sm:$0xff]  ;;  %v4207_v17 = vld [vmem:[%s4496_s16] sm:$0xff]  ;;  %v4253_v27 = vld [vmem:[%s4496_s16 + $0x170] sm:$0xff] }
 0x100   : > { %v4231_v18 = vld [vmem:[%s4496_s16 + $0xc0] sm:$0xff]  ;;  %v4246_v19 = vld [vmem:[%s4496_s16 + $0x138] sm:$0xff]  ;;  %v4261_v28 = vld [vmem:[%s4496_s16 + $0x1b0] sm:$0xff] }
 0x101   : > { %v4270_v20 = vld [vmem:[%s4496_s16 + $0x1f8] sm:$0xff]  ;;  %v4252_v31 = vld [vmem:[%s4496_s16 + $0x168] sm:$0xff] }
 0x102   : > { %v4260_v32 = vld [vmem:[%s4496_s16 + $0x1a8] sm:$0xff] }
 0x16c   : > { %v1131_v50 = vpop.f32.mrf.mxu0 }
 0x16d   : > { %v1132_v51 = vadd.f32 %v1131_v50, %v1109_v49  ;;  %v3462_v49 = vor.u32 %v4177_v43, %v3459_v45  ;;  %v3497_v43 = vld [vmem:[%s4486_s27 + $0x38] sm:$0xf]  ;;  %v4182_v45 = vld [vmem:[%s4486_s27 + $0x3c] sm:$0xf] }
 0x16f   : > { %v1134_v52 = vadd.f32 %v1132_v51, %v1103_v47  ;;  %v4186_v47 = vld [vmem:[%s4486_s27 + $0x54] sm:$0xf0]  ;;  %v4178_v51 = vld [vmem:[%s4486_s27 + $0x1c] sm:$0xf]  ;;  %1495 = vmatpush.bf16.msrb.mxu2 %v3462_v49  ;;  %v3494_v49 = vor.u32 %v4181_v41, %v3491_v42 }
 0x170   : > { %v3466_v50 = vor.u32 %v4186_v47, %v3465_v46  ;;  %v3499_v46 = vld [vmem:[%s4486_s27 + $0x78] sm:$0xf0]  ;;  %v3490_v47 = vor.u32 %v4189_v38, %v3489_v37 }
 0x171   : > { %v1136_v53 = vsel %vm1135_vm2, %v1134_v52, 0.0  ;;  %v4242_v37 = vld [vmem:[%s4496_s16 + $0x118] sm:$0xff] }
 0x172   : > { %1137 = vadd.xlane.f32.xlu0 %v1136_v53  ;;  %1508 = vmatpush.bf16.msrb.mxu3 %v3466_v50  ;;  %v3498_v50 = vor.u32 %v4190_v44, %v3497_v43  ;;  %v4266_v38 = vld [vmem:[%s4496_s16 + $0x1d8] sm:$0xff]  ;;  %v4240_v43 = vld [vmem:[%s4496_s16 + $0x108] sm:$0xff] }
 0x173   : > { %v4250_v41 = vld [vmem:[%s4496_s16 + $0x158] sm:$0xff]  ;;  %v4264_v44 = vld [vmem:[%s4496_s16 + $0x1c8] sm:$0xff] }
 0x174   : > { %v4258_v42 = vld [vmem:[%s4496_s16 + $0x198] sm:$0xff] }
 0x1e5   : > { %v1138_v61 = vpop.xlane.xlu0 %1137 }
 0x1e6   : > { %v1146_v62 = vmul.f32 %v4715_v60, %v1138_v61  ;;  %v1165_v61 = vperm.slane %v4711_v48, 1 }
 0x1e8   : > { %v4718_v63 = vsub.f32 %v1134_v52, %v1146_v62  ;;  %v3467_v52 = vld [vmem:[%s4486_s27 + $0x58] sm:$0xf0] }
 0x1e9   : > { %v3470_v53 = vor.u32 %v4178_v51, %v3467_v52  ;;  %v3502_v51 = vor.u32 %v4182_v45, %v3499_v46  ;;  %v4214_v52 = vld [vmem:[%s4496_s16 + $0x38] sm:$0xff]  ;;  %v4249_v45 = vld [vmem:[%s4496_s16 + $0x150] sm:$0xff] }
 0x1ea   : > { %v1148_v0 = vmul.f32 %v4718_v63, %v4718_v63  ;;  %v4257_v46 = vld [vmem:[%s4496_s16 + $0x190] sm:$0xff] }
 0x1eb   : > { %1521 = vmatpush.bf16.msra.mxu0 %v3470_v53  ;;  %v4238_v53 = vld [vmem:[%s4496_s16 + $0xf8] sm:$0xff] }
 0x1ec   : > { %v1149_v1 = vsel %vm1135_vm2, %v1148_v0, 0.0  ;;  %v1167_v0 = vperm.slane %v4711_v48, 2  ;;  %v3547_v48 = vld [vmem:[%s4486_s27 + $0xe8] sm:$0xf0] }
 0x1ed   : > { %1150 = vadd.xlane.f32.xlu0 %v1149_v1  ;;  %v3550_v16 = vor.u32 %v4196_v10, %v3547_v48  ;;  %v4226_v10 = vld [vmem:[%s4496_s16 + $0x98] sm:$0xff]  ;;  %v4209_v48 = vld [vmem:[%s4496_s16 + $0x10] sm:$0xff] }
 0x260   : > { %v1151_v26 = vpop.xlane.xlu0 %1150 }
 0x261   : > { %v1152_v30 = vmul.f32 %v1151_v26, %v4715_v60  ;;  %v3486_v26 = vor.u32 %v4180_v21, %v3483_v22  ;;  %v4215_v21 = vld [vmem:[%s4496_s16 + $0x40] sm:$0xff] }
 0x262   : > { %v4223_v22 = vld [vmem:[%s4496_s16 + $0x80] sm:$0xff] }
 0x263   : > { %v1153_v40 = vadd.f32 1e-05, %v1152_v30  ;;  %v3555_v30 = vld [vmem:[%s4486_s27 + $0xf0] sm:$0xf0] }
 0x264   : > { %v3558_v36 = vor.u32 %v4197_v29, %v3555_v30  ;;  %v4244_v29 = vld [vmem:[%s4496_s16 + $0x128] sm:$0xff] }
 0x265   : > { %4354 = vrsqrt.f32 %v1153_v40  ;;  %vm1160_vm5 = vweird.f32 %v1153_v40  ;;  %v4268_v30 = vld [vmem:[%s4496_s16 + $0x1e8] sm:$0xff] }
 0x26b   : > { %v4355_v54 = vpop.eup %4354 }
 0x26c   : > { %v1155_v55 = vmul.f32 %v4355_v54, %v1153_v40  ;;  %vm1161_vm4 = vweird.f32 %v4355_v54  ;;  %v3566_v40 = vor.u32 %v4198_v33, %v3563_v34  ;;  %v4243_v33 = vld [vmem:[%s4496_s16 + $0x120] sm:$0xff] }
 0x26d   : > { %vm1162_vm6 = vmor %vm1160_vm5, %vm1161_vm4  ;;  %v4267_v34 = vld [vmem:[%s4496_s16 + $0x1e0] sm:$0xff] }
 0x26e   : > { %v1156_v56 = vmul.f32 %v4355_v54, %v1155_v55  ;;  %v4230_v55 = vld [vmem:[%s4496_s16 + $0xb8] sm:$0xff] }
 0x270   : > { %v1157_v57 = vmul.f32 0.5, %v1156_v56  ;;  %v4213_v56 = vld [vmem:[%s4496_s16 + $0x30] sm:$0xff] }
 0x272   : > { %v1158_v58 = vsub.f32 1.5, %v1157_v57  ;;  %v4237_v57 = vld [vmem:[%s4496_s16 + $0xf0] sm:$0xff] }
 0x274   : > { %v1159_v59 = vmul.f32 %v4355_v54, %v1158_v58  ;;  %v4221_v58 = vld [vmem:[%s4496_s16 + $0x70] sm:$0xff] }
 0x276   : > { %v1163_v62 = vsel %vm1162_vm6, %v4355_v54, %v1159_v59  ;;  %v4222_v54 = vld [vmem:[%s4496_s16 + $0x78] sm:$0xff]  ;;  %v4229_v59 = vld [vmem:[%s4496_s16 + $0xb0] sm:$0xff] }
 0x277   : > { %v1164_v1 = vmul.f32 %v1163_v62, %v4718_v63  ;;  %v4236_v62 = vld [vmem:[%s4496_s16 + $0xe8] sm:$0xff] }
 0x279   : > { %v1166_v2 = vmul.f32 %v1165_v61, %v1164_v1  ;;  %v4212_v61 = vld [vmem:[%s4496_s16 + $0x28] sm:$0xff] }
 0x27a   : > { %v4228_v1 = vld [vmem:[%s4496_s16 + $0xa8] sm:$0xff] }
 0x27b   : > { %v4764_v8 = vadd.f32 %v1167_v0, %v1166_v2  ;;  %v4220_v0 = vld [vmem:[%s4496_s16 + $0x68] sm:$0xff]  ;;  %v4211_v2 = vld [vmem:[%s4496_s16 + $0x20] sm:$0xff] }
 0x27d   : > { %v4771_v63 = vpack.c.bf16 %v4764_v8, %v4764_v8 }
 0x27f   : > { %3567 = vmatmul.msk.bf16.vlgmr.msra.gmra.mxu1 %vm1110_vm1, %v4771_v63  ;;  %3568 = vmatmul.msk.bf16.vlgmr.msra.gmra.mxu2 %vm1110_vm1, %v4771_v63 }
 0x280   : > { %3569 = vmatmul.msk.bf16.vlgmr.msra.gmra.mxu3 %vm1110_vm1, %v4771_v63  ;;  %3570 = vmatmul.msk.bf16.vlgmr.msrb.gmra.mxu0 %vm1110_vm1, %v4771_v63 }
 0x281   : > { %1533 = vmatpush.bf16.msra.mxu1 %v3538_v11  ;;  %1546 = vmatpush.bf16.msra.mxu2 %v3542_v12  ;;  %v4233_v11 = vld [vmem:[%s4496_s16 + $0xd0] sm:$0xff] }
 0x282   : > { %1559 = vmatpush.bf16.msra.mxu3 %v3546_v15  ;;  %1572 = vmatpush.bf16.msrb.mxu0 %v3550_v16  ;;  %v4217_v12 = vld [vmem:[%s4496_s16 + $0x50] sm:$0xff]  ;;  %v4216_v15 = vld [vmem:[%s4496_s16 + $0x48] sm:$0xff] }
 0x283   : > { %v4224_v16 = vld [vmem:[%s4496_s16 + $0x88] sm:$0xff] }
 0x285   : > { %1534 = vmatpush.bf16.msra.mxu1 %v3474_v23  ;;  %1547 = vmatpush.bf16.msra.mxu2 %v3478_v24  ;;  %v4254_v23 = vld [vmem:[%s4496_s16 + $0x178] sm:$0xff] }
 0x286   : > { %1560 = vmatpush.bf16.msra.mxu3 %v3482_v25  ;;  %1573 = vmatpush.bf16.msrb.mxu0 %v3486_v26  ;;  %v4262_v24 = vld [vmem:[%s4496_s16 + $0x1b8] sm:$0xff]  ;;  %v4245_v25 = vld [vmem:[%s4496_s16 + $0x130] sm:$0xff] }
 0x287   : > { %v4269_v26 = vld [vmem:[%s4496_s16 + $0x1f0] sm:$0xff] }
 0x28f   : > { %3571 = vmatmul.msk.bf16.vlgmr.msrb.gmra.mxu1 %vm1110_vm1, %v4771_v63  ;;  %3572 = vmatmul.msk.bf16.vlgmr.msrb.gmra.mxu2 %vm1110_vm1, %v4771_v63 }
 0x290   : > { %3573 = vmatmul.msk.bf16.vlgmr.msrb.gmra.mxu3 %vm1110_vm1, %v4771_v63  ;;  %3574 = vmatmul.msk.bf16.vlgmr.msra.gmra.mxu0 %vm1110_vm1, %v4771_v63 }
 0x291   : > { %1585 = vmatpush.bf16.msrb.mxu1 %v3554_v35  ;;  %1598 = vmatpush.bf16.msrb.mxu2 %v3558_v36  ;;  %v4251_v35 = vld [vmem:[%s4496_s16 + $0x160] sm:$0xff] }
 0x292   : > { %1611 = vmatpush.bf16.msrb.mxu3 %v3562_v39  ;;  %1624 = vmatpush.bf16.msra.mxu0 %v3566_v40  ;;  %v4259_v36 = vld [vmem:[%s4496_s16 + $0x1a0] sm:$0xff]  ;;  %v4241_v39 = vld [vmem:[%s4496_s16 + $0x110] sm:$0xff] }
 0x293   : > { %v4265_v40 = vld [vmem:[%s4496_s16 + $0x1d0] sm:$0xff] }
 0x295   : > { %1586 = vmatpush.bf16.msrb.mxu1 %v3490_v47  ;;  %1599 = vmatpush.bf16.msrb.mxu2 %v3494_v49  ;;  %v4239_v47 = vld [vmem:[%s4496_s16 + $0x100] sm:$0xff] }
 0x296   : > { %1612 = vmatpush.bf16.msrb.mxu3 %v3498_v50  ;;  %1625 = vmatpush.bf16.msra.mxu0 %v3502_v51  ;;  %v4263_v49 = vld [vmem:[%s4496_s16 + $0x1c0] sm:$0xff]  ;;  %v4248_v50 = vld [vmem:[%s4496_s16 + $0x148] sm:$0xff] }
 0x297   : > { %v4256_v51 = vld [vmem:[%s4496_s16 + $0x188] sm:$0xff] }
 0x29f   : > { %3575 = vmatmul.msk.bf16.vlgmr.msra.gmra.mxu1 %vm1110_vm1, %v4771_v63  ;;  %3576 = vmatmul.msk.bf16.vlgmr.msra.gmra.mxu2 %vm1110_vm1, %v4771_v63 }
 0x2a0   : > { %3577 = vmatmul.msk.bf16.vlgmr.msra.gmra.mxu3 %vm1110_vm1, %v4771_v63  ;;  %3578 = vmatmul.msk.bf16.vlgmr.msrb.gmra.mxu0 %vm1110_vm1, %v4771_v63 }
 0x2a1   : > { %2688 = vmatpush.bf16.msra.mxu1 %v4214_v52  ;;  %2727 = vmatpush.bf16.msrb.mxu0 %v4238_v53  ;;  %v4247_v52 = vld [vmem:[%s4496_s16 + $0x140] sm:$0xff] }
 0x2a2   : > { %2701 = vmatpush.bf16.msra.mxu2 %v4222_v54  ;;  %2714 = vmatpush.bf16.msra.mxu3 %v4230_v55  ;;  %v4255_v53 = vld [vmem:[%s4496_s16 + $0x180] sm:$0xff] }
 0x2a3   : > { %v1202_v54 = vld [vmem:[%s4491_s13] sm:$0xff] }
 0x2a4   : > { %v1204_v55 = vunpack.c.l.bf16 %v1202_v54 }
 0x2a5   : > { %2689 = vmatpush.bf16.msra.mxu1 %v4213_v56  ;;  %2728 = vmatpush.bf16.msrb.mxu0 %v4237_v57 }
 0x2a6   : > { %2702 = vmatpush.bf16.msra.mxu2 %v4221_v58  ;;  %2715 = vmatpush.bf16.msra.mxu3 %v4229_v59  ;;  %v1212_v56 = vperm.slane %v1204_v55, 0  ;;  %v1215_v57 = vperm.slane %v1204_v55, 6 }
 0x2a8   : > { %v1244_v58 = vperm.slane %v1212_v56, 0  ;;  %v1247_v59 = vperm.slane %v1215_v57, 0 }
 0x2a9   : > { %2690 = vmatpush.bf16.msra.mxu1 %v4212_v61  ;;  %2729 = vmatpush.bf16.msrb.mxu0 %v4236_v62  ;;  %v1213_v61 = vperm.slane %v1204_v55, 2 }
 0x2aa   : > { %2703 = vmatpush.bf16.msra.mxu2 %v4220_v0  ;;  %2716 = vmatpush.bf16.msra.mxu3 %v4228_v1  ;;  %v1214_v0 = vperm.slane %v1204_v55, 4 }
 0x2ad   : > { %2691 = vmatpush.bf16.msra.mxu1 %v4211_v2  ;;  %2730 = vmatpush.bf16.msrb.mxu0 %v4235_v3 }
 0x2ae   : > { %2704 = vmatpush.bf16.msra.mxu2 %v4219_v4  ;;  %2717 = vmatpush.bf16.msra.mxu3 %v4227_v5  ;;  %v1245_v5 = vperm.slane %v1213_v61, 0 }
 0x2af   : > { %3579 = vmatmul.msk.bf16.vlgmr.msrb.gmra.mxu1 %vm1110_vm1, %v4771_v63  ;;  %3580 = vmatmul.msk.bf16.vlgmr.msrb.gmra.mxu2 %vm1110_vm1, %v4771_v63 }
 0x2b0   : > { %3581 = vmatmul.msk.bf16.vlgmr.msrb.gmra.mxu3 %vm1110_vm1, %v4771_v63  ;;  %3582 = vmatmul.msk.bf16.vlgmr.msra.gmra.mxu0 %vm1110_vm1, %v4771_v63  ;;  %v4232_v63 = vld [vmem:[%s4496_s16 + $0xc8] sm:$0xff] }
 0x2b1   : > { %2692 = vmatpush.bf16.msra.mxu1 %v4210_v6  ;;  %2731 = vmatpush.bf16.msrb.mxu0 %v4234_v7  ;;  %v1246_v7 = vperm.slane %v1214_v0, 0 }
 0x2b2   : > { %2705 = vmatpush.bf16.msra.mxu2 %v4218_v9  ;;  %2718 = vmatpush.bf16.msra.mxu3 %v4226_v10  ;;  %v4278_v9 = vld [vmem:[%s4496_s16 + $0x238] sm:$0xff] }
 0x2b5   : > { %2693 = vmatpush.bf16.msra.mxu1 %v4209_v48  ;;  %2732 = vmatpush.bf16.msrb.mxu0 %v4233_v11  ;;  %v4302_v48 = vld [vmem:[%s4496_s16 + $0x2f8] sm:$0xff]  ;;  %v1205_v11 = vunpack.c.h.bf16 %v1202_v54 }
 0x2b6   : > { %2706 = vmatpush.bf16.msra.mxu2 %v4217_v12  ;;  %2719 = vmatpush.bf16.msra.mxu3 %v4225_v13  ;;  %v4298_v54 = vld [vmem:[%s4496_s16 + $0x2d8] sm:$0xff] }
 0x2b9   : > { %2694 = vmatpush.bf16.msra.mxu1 %v4208_v14  ;;  %2733 = vmatpush.bf16.msrb.mxu0 %v4232_v63 }
 0x2ba   : > { %2707 = vmatpush.bf16.msra.mxu2 %v4216_v15  ;;  %2720 = vmatpush.bf16.msra.mxu3 %v4224_v16 }
 0x2bd   : > { %2695 = vmatpush.bf16.msra.mxu1 %v4207_v17  ;;  %2734 = vmatpush.bf16.msrb.mxu0 %v4231_v18  ;;  %v4277_v17 = vld [vmem:[%s4496_s16 + $0x230] sm:$0xff] }
 0x2be   : > { %2708 = vmatpush.bf16.msra.mxu2 %v4215_v21  ;;  %2721 = vmatpush.bf16.msra.mxu3 %v4223_v22  ;;  %v1216_v21 = vperm.slane %v1205_v11, 0 }
 0x2c1   : > { %2740 = vmatpush.bf16.msrb.mxu1 %v4246_v19  ;;  %2779 = vmatpush.bf16.msra.mxu0 %v4270_v20  ;;  %v4301_v20 = vld [vmem:[%s4496_s16 + $0x2f0] sm:$0xff] }
 0x2c2   : > { %2753 = vmatpush.bf16.msrb.mxu2 %v4254_v23  ;;  %2766 = vmatpush.bf16.msrb.mxu3 %v4262_v24  ;;  %v4286_v23 = vld [vmem:[%s4496_s16 + $0x278] sm:$0xff]  ;;  %v1219_v24 = vperm.slane %v1205_v11, 6 }
 0x2c5   : > { %2741 = vmatpush.bf16.msrb.mxu1 %v4245_v25  ;;  %2780 = vmatpush.bf16.msra.mxu0 %v4269_v26  ;;  %v4294_v26 = vld [vmem:[%s4496_s16 + $0x2b8] sm:$0xff] }
 0x2c6   : > { %2754 = vmatpush.bf16.msrb.mxu2 %v4253_v27  ;;  %2767 = vmatpush.bf16.msrb.mxu3 %v4261_v28  ;;  %v4276_v28 = vld [vmem:[%s4496_s16 + $0x228] sm:$0xff] }
 0x2c9   : > { %2742 = vmatpush.bf16.msrb.mxu1 %v4244_v29  ;;  %2781 = vmatpush.bf16.msra.mxu0 %v4268_v30  ;;  %v4300_v29 = vld [vmem:[%s4496_s16 + $0x2e8] sm:$0xff]  ;;  %v1248_v30 = vperm.slane %v1216_v21, 0 }
 0x2ca   : > { %2755 = vmatpush.bf16.msrb.mxu2 %v4252_v31  ;;  %2768 = vmatpush.bf16.msrb.mxu3 %v4260_v32  ;;  %v1251_v32 = vperm.slane %v1219_v24, 0 }
 0x2cd   : > { %2743 = vmatpush.bf16.msrb.mxu1 %v4243_v33  ;;  %2782 = vmatpush.bf16.msra.mxu0 %v4267_v34  ;;  %v4285_v33 = vld [vmem:[%s4496_s16 + $0x270] sm:$0xff] }
 0x2ce   : > { %2756 = vmatpush.bf16.msrb.mxu2 %v4251_v35  ;;  %2769 = vmatpush.bf16.msrb.mxu3 %v4259_v36  ;;  %v4293_v35 = vld [vmem:[%s4496_s16 + $0x2b0] sm:$0xff]  ;;  %v1217_v36 = vperm.slane %v1205_v11, 2 }
 0x2d1   : > { %2744 = vmatpush.bf16.msrb.mxu1 %v4242_v37  ;;  %2783 = vmatpush.bf16.msra.mxu0 %v4266_v38  ;;  %v4275_v38 = vld [vmem:[%s4496_s16 + $0x220] sm:$0xff] }
 0x2d2   : > { %2757 = vmatpush.bf16.msrb.mxu2 %v4250_v41  ;;  %2770 = vmatpush.bf16.msrb.mxu3 %v4258_v42  ;;  %v4299_v42 = vld [vmem:[%s4496_s16 + $0x2e0] sm:$0xff] }
 0x2d5   : > { %2745 = vmatpush.bf16.msrb.mxu1 %v4241_v39  ;;  %2784 = vmatpush.bf16.msra.mxu0 %v4265_v40  ;;  %v1218_v39 = vperm.slane %v1205_v11, 4  ;;  %v4290_v11 = vld [vmem:[%s4496_s16 + $0x298] sm:$0xff] }
 0x2d6   : > { %2758 = vmatpush.bf16.msrb.mxu2 %v4249_v45  ;;  %2771 = vmatpush.bf16.msrb.mxu3 %v4257_v46  ;;  %v4908_v45 = vld [vmem:[%s4491_s13 + $0x8] sm:$0xff] }
 0x2d7   : > { %v1206_v55 = vunpack.c.l.bf16 %v4908_v45 }
 0x2d9   : > { %2746 = vmatpush.bf16.msrb.mxu1 %v4240_v43  ;;  %2785 = vmatpush.bf16.msra.mxu0 %v4264_v44  ;;  %v4284_v44 = vld [vmem:[%s4496_s16 + $0x268] sm:$0xff] }
 0x2da   : > { %2759 = vmatpush.bf16.msrb.mxu2 %v4248_v50  ;;  %2772 = vmatpush.bf16.msrb.mxu3 %v4256_v51  ;;  %v1250_v51 = vperm.slane %v1218_v39, 0 }
 0x2dd   : > { %2747 = vmatpush.bf16.msrb.mxu1 %v4239_v47  ;;  %2786 = vmatpush.bf16.msra.mxu0 %v4263_v49  ;;  %v4292_v47 = vld [vmem:[%s4496_s16 + $0x2a8] sm:$0xff]  ;;  %v1249_v49 = vperm.slane %v1217_v36, 0 }
 0x2de   : > { %2760 = vmatpush.bf16.msrb.mxu2 %v4247_v52  ;;  %2773 = vmatpush.bf16.msrb.mxu3 %v4255_v53  ;;  %v4274_v52 = vld [vmem:[%s4496_s16 + $0x218] sm:$0xff] }
 0x2fc   : > { %v1432_v62 = vpop.f32.mrf.mxu1 }
 0x2fd   : > { %v1433_v1 = vadd.f32 %v1432_v62, %v1244_v58  ;;  %v1471_v2 = vpop.f32.mrf.mxu0  ;;  %v4283_v58 = vld [vmem:[%s4496_s16 + $0x260] sm:$0xff] }
 0x2fe   : > { %v1472_v3 = vadd.f32 %v1471_v2, %v1247_v59  ;;  %v4291_v62 = vld [vmem:[%s4496_s16 + $0x2a0] sm:$0xff]  ;;  %v4273_v2 = vld [vmem:[%s4496_s16 + $0x210] sm:$0xff] }
 0x2ff   : > { %v1631_v4 = vmax.f32 %v1433_v1, 0.0 }
 0x300   : > { %v1634_v6 = vmax.f32 %v1472_v3, 0.0 }
 0x301   : > { %v1647_v10 = vpack.c.bf16 %v1631_v4, %v1631_v4 }
 0x302   : > { %v1650_v12 = vpack.c.bf16 %v1634_v6, %v1634_v6  ;;  %v1445_v13 = vpop.f32.mrf.mxu2  ;;  %v1220_v6 = vperm.slane %v1206_v55, 0 }
 0x303   : > { %v1446_v14 = vadd.f32 %v1445_v13, %v1245_v5  ;;  %v1458_v63 = vpop.f32.mrf.mxu3  ;;  %2696 = vmatmul.bf16.vlgmr.msra.gmra.mxu1 %v1647_v10  ;;  %v4297_v5 = vld [vmem:[%s4496_s16 + $0x2d0] sm:$0xff]  ;;  %v1223_v10 = vperm.slane %v1206_v55, 6  ;;  %v4272_v13 = vld [vmem:[%s4496_s16 + $0x208] sm:$0xff] }
 0x304   : > { %v1459_v15 = vadd.f32 %v1458_v63, %v1246_v7  ;;  %2735 = vmatmul.bf16.vlgmr.msrb.gmra.mxu0 %v1650_v12  ;;  %2792 = vmatpush.bf16.msra.mxu1 %v4278_v9  ;;  %v1434_v16 = vpop.f32.mrf.mxu1  ;;  %v4282_v9 = vld [vmem:[%s4496_s16 + $0x258] sm:$0xff]  ;;  %v1252_v63 = vperm.slane %v1220_v6, 0 }
 0x305   : > { %v1632_v18 = vmax.f32 %v1446_v14, 0.0  ;;  %2831 = vmatpush.bf16.msrb.mxu0 %v4302_v48  ;;  %v1473_v19 = vpop.f32.mrf.mxu0  ;;  %v4296_v14 = vld [vmem:[%s4496_s16 + $0x2c8] sm:$0xff]  ;;  %v1255_v16 = vperm.slane %v1223_v10, 0  ;;  %v4330_v10 = vld [vmem:[%s4496_s16 + $0x3d8] sm:$0xff] }
 0x306   : > { %v1633_v22 = vmax.f32 %v1459_v15, 0.0  ;;  %v4289_v19 = vld [vmem:[%s4496_s16 + $0x290] sm:$0xff] }
 0x307   : > { %v1648_v25 = vpack.c.bf16 %v1632_v18, %v1632_v18 }
 0x308   : > { %v1649_v27 = vpack.c.bf16 %v1633_v22, %v1633_v22  ;;  %2793 = vmatpush.bf16.msra.mxu1 %v4277_v17  ;;  %v4281_v17 = vld [vmem:[%s4496_s16 + $0x250] sm:$0xff]  ;;  %v4271_v22 = vld [vmem:[%s4496_s16 + $0x200] sm:$0xff] }
 0x309   : > { %2832 = vmatpush.bf16.msrb.mxu0 %v4301_v20  ;;  %2709 = vmatmul.bf16.vlgmr.msra.gmra.mxu2 %v1648_v25  ;;  %v1221_v20 = vperm.slane %v1206_v55, 2 }
 0x30a   : > { %2722 = vmatmul.bf16.vlgmr.msra.gmra.mxu3 %v1649_v27  ;;  %2805 = vmatpush.bf16.msra.mxu2 %v4286_v23  ;;  %v1447_v31 = vpop.f32.mrf.mxu2  ;;  %v1222_v23 = vperm.slane %v1206_v55, 4  ;;  %v4310_v27 = vld [vmem:[%s4496_s16 + $0x338] sm:$0xff]  ;;  %v4332_v55 = vld [vmem:[%s4496_s16 + $0x3e8] sm:$0xff] }
 0x30b   : > { %2818 = vmatpush.bf16.msra.mxu3 %v4294_v26  ;;  %v1460_v34 = vpop.f32.mrf.mxu3  ;;  %v4295_v26 = vld [vmem:[%s4496_s16 + $0x2c0] sm:$0xff] }
 0x30c   : > { %2794 = vmatpush.bf16.msra.mxu1 %v4276_v28  ;;  %v1484_v37 = vpop.f32.mrf.mxu1 }
 0x30d   : > { %2833 = vmatpush.bf16.msrb.mxu0 %v4300_v29  ;;  %v1485_v40 = vadd.f32 %v1484_v37, %v1248_v30  ;;  %v1523_v41 = vpop.f32.mrf.mxu0  ;;  %v4334_v29 = vld [vmem:[%s4496_s16 + $0x3f8] sm:$0xff]  ;;  %v4280_v30 = vld [vmem:[%s4496_s16 + $0x248] sm:$0xff]  ;;  %v4309_v37 = vld [vmem:[%s4496_s16 + $0x330] sm:$0xff] }
 0x30e   : > { %v1524_v43 = vadd.f32 %v1523_v41, %v1251_v32  ;;  %2806 = vmatpush.bf16.msra.mxu2 %v4285_v33  ;;  %v4288_v32 = vld [vmem:[%s4496_s16 + $0x288] sm:$0xff]  ;;  %v1253_v33 = vperm.slane %v1221_v20, 0  ;;  %v4279_v41 = vld [vmem:[%s4496_s16 + $0x240] sm:$0xff]  ;;  %v4322_v20 = vld [vmem:[%s4496_s16 + $0x398] sm:$0xff] }
 0x30f   : > { %v1635_v46 = vmax.f32 %v1485_v40, 0.0  ;;  %2819 = vmatpush.bf16.msra.mxu3 %v4293_v35  ;;  %v1254_v35 = vperm.slane %v1222_v23, 0  ;;  %v4333_v40 = vld [vmem:[%s4496_s16 + $0x3f0] sm:$0xff]  ;;  %v4304_v23 = vld [vmem:[%s4496_s16 + $0x308] sm:$0xff] }
 0x310   : > { %v1638_v50 = vmax.f32 %v1524_v43, 0.0  ;;  %2795 = vmatpush.bf16.msra.mxu1 %v4275_v38 }
 0x311   : > { %v1651_v53 = vpack.c.bf16 %v1635_v46, %v1635_v46  ;;  %2834 = vmatpush.bf16.msrb.mxu0 %v4299_v42  ;;  %v4318_v46 = vld [vmem:[%s4496_s16 + $0x378] sm:$0xff] }
 0x312   : > { %v1654_v56 = vpack.c.bf16 %v1638_v50, %v1638_v50  ;;  %2807 = vmatpush.bf16.msra.mxu2 %v4284_v44  ;;  %v1497_v57 = vpop.f32.mrf.mxu2  ;;  %v4287_v44 = vld [vmem:[%s4496_s16 + $0x280] sm:$0xff]  ;;  %v4326_v50 = vld [vmem:[%s4496_s16 + $0x3b8] sm:$0xff] }
 0x313   : > { %2820 = vmatpush.bf16.msra.mxu3 %v4292_v47  ;;  %v1498_v59 = vadd.f32 %v1497_v57, %v1249_v49  ;;  %v1510_v61 = vpop.f32.mrf.mxu3  ;;  %2748 = vmatmul.bf16.vlgmr.msrb.gmra.mxu1 %v1651_v53  ;;  %v4308_v53 = vld [vmem:[%s4496_s16 + $0x328] sm:$0xff]  ;;  %v4317_v57 = vld [vmem:[%s4496_s16 + $0x370] sm:$0xff] }
 0x314   : > { %v1511_v0 = vadd.f32 %v1510_v61, %v1250_v51  ;;  %2787 = vmatmul.bf16.vlgmr.msra.gmra.mxu0 %v1654_v56  ;;  %2796 = vmatpush.bf16.msra.mxu1 %v4274_v52  ;;  %v1486_v1 = vpop.f32.mrf.mxu1  ;;  %v4307_v61 = vld [vmem:[%s4496_s16 + $0x320] sm:$0xff] }
 0x315   : > { %v1636_v3 = vmax.f32 %v1498_v59, 0.0  ;;  %2835 = vmatpush.bf16.msrb.mxu0 %v4298_v54  ;;  %v1525_v4 = vpop.f32.mrf.mxu0  ;;  %v4325_v59 = vld [vmem:[%s4496_s16 + $0x3b0] sm:$0xff]  ;;  %v4331_v1 = vld [vmem:[%s4496_s16 + $0x3e0] sm:$0xff] }
 0x316   : > { %v1637_v7 = vmax.f32 %v1511_v0, 0.0  ;;  %2808 = vmatpush.bf16.msra.mxu2 %v4283_v58  ;;  %v1207_v0 = vunpack.c.h.bf16 %v4908_v45  ;;  %v4315_v45 = vld [vmem:[%s4496_s16 + $0x360] sm:$0xff] }
 0x317   : > { %v1652_v48 = vpack.c.bf16 %v1636_v3, %v1636_v3  ;;  %2821 = vmatpush.bf16.msra.mxu3 %v4291_v62  ;;  %v4316_v3 = vld [vmem:[%s4496_s16 + $0x368] sm:$0xff] }
 0x318   : > { %v1653_v12 = vpack.c.bf16 %v1637_v7, %v1637_v7  ;;  %2797 = vmatpush.bf16.msra.mxu1 %v4273_v2  ;;  %v4306_v7 = vld [vmem:[%s4496_s16 + $0x318] sm:$0xff] }
 0x319   : > { %2836 = vmatpush.bf16.msrb.mxu0 %v4297_v5  ;;  %2761 = vmatmul.bf16.vlgmr.msrb.gmra.mxu2 %v1652_v48  ;;  %v4324_v5 = vld [vmem:[%s4496_s16 + $0x3a8] sm:$0xff]  ;;  %v1227_v48 = vperm.slane %v1207_v0, 6 }
 0x31a   : > { %2774 = vmatmul.bf16.vlgmr.msrb.gmra.mxu3 %v1653_v12  ;;  %2809 = vmatpush.bf16.msra.mxu2 %v4282_v9  ;;  %v1499_v15 = vpop.f32.mrf.mxu2  ;;  %v1224_v9 = vperm.slane %v1207_v0, 0  ;;  %v4305_v12 = vld [vmem:[%s4496_s16 + $0x310] sm:$0xff] }
 0x31b   : > { %2822 = vmatpush.bf16.msra.mxu3 %v4290_v11  ;;  %v1512_v18 = vpop.f32.mrf.mxu3  ;;  %v4323_v11 = vld [vmem:[%s4496_s16 + $0x3a0] sm:$0xff]  ;;  %v1259_v15 = vperm.slane %v1227_v48, 0 }
 0x31c   : > { %2798 = vmatpush.bf16.msra.mxu1 %v4272_v13  ;;  %v1536_v21 = vpop.f32.mrf.mxu1  ;;  %v1256_v13 = vperm.slane %v1224_v9, 0  ;;  %v1225_v18 = vperm.slane %v1207_v0, 2 }
 0x31d   : > { %2837 = vmatpush.bf16.msrb.mxu0 %v4296_v14  ;;  %v1537_v24 = vadd.f32 %v1536_v21, %v1252_v63  ;;  %v1575_v25 = vpop.f32.mrf.mxu0  ;;  %v4329_v63 = vld [vmem:[%s4496_s16 + $0x3d0] sm:$0xff]  ;;  %v1226_v21 = vperm.slane %v1207_v0, 4 }
 0x31e   : > { %v1576_v28 = vadd.f32 %v1575_v25, %v1255_v16  ;;  %2810 = vmatpush.bf16.msra.mxu2 %v4281_v17  ;;  %v4314_v17 = vld [vmem:[%s4496_s16 + $0x358] sm:$0xff]  ;;  %v4328_v25 = vld [vmem:[%s4496_s16 + $0x3c8] sm:$0xff] }
 0x31f   : > { %v1639_v31 = vmax.f32 %v1537_v24, 0.0  ;;  %2823 = vmatpush.bf16.msra.mxu3 %v4289_v19 }
 0x320   : > { %v1642_v34 = vmax.f32 %v1576_v28, 0.0  ;;  %2799 = vmatpush.bf16.msra.mxu1 %v4271_v22  ;;  %v1257_v28 = vperm.slane %v1225_v18, 0 }
 0x321   : > { %v1655_v36 = vpack.c.bf16 %v1639_v31, %v1639_v31  ;;  %2838 = vmatpush.bf16.msrb.mxu0 %v4295_v26  ;;  %v4303_v31 = vld [vmem:[%s4496_s16 + $0x300] sm:$0xff] }
 0x322   : > { %v1658_v38 = vpack.c.bf16 %v1642_v34, %v1642_v34  ;;  %2811 = vmatpush.bf16.msra.mxu2 %v4280_v30  ;;  %v1549_v39 = vpop.f32.mrf.mxu2  ;;  %v1258_v30 = vperm.slane %v1226_v21, 0  ;;  %v4327_v34 = vld [vmem:[%s4496_s16 + $0x3c0] sm:$0xff] }
 0x323   : > { %2824 = vmatpush.bf16.msra.mxu3 %v4288_v32  ;;  %v1550_v42 = vadd.f32 %v1549_v39, %v1253_v33  ;;  %v1562_v43 = vpop.f32.mrf.mxu3  ;;  %2800 = vmatmul.bf16.vlgmr.msra.gmra.mxu1 %v1655_v36  ;;  %v4320_v39 = vld [vmem:[%s4496_s16 + $0x388] sm:$0xff] }
 0x324   : > { %2844 = vmatpush.bf16.msrb.mxu1 %v4310_v27  ;;  %v1563_v47 = vadd.f32 %v1562_v43, %v1254_v35  ;;  %2839 = vmatmul.bf16.vlgmr.msrb.gmra.mxu0 %v1658_v38  ;;  %v1538_v49 = vpop.f32.mrf.mxu1  ;;  %v4313_v27 = vld [vmem:[%s4496_s16 + $0x350] sm:$0xff]  ;;  %v4311_v43 = vld [vmem:[%s4496_s16 + $0x340] sm:$0xff] }
 0x325   : > { %2883 = vmatpush.bf16.msra.mxu0 %v4334_v29  ;;  %v1640_v51 = vmax.f32 %v1550_v42, 0.0  ;;  %v1577_v52 = vpop.f32.mrf.mxu0  ;;  %v4321_v29 = vld [vmem:[%s4496_s16 + $0x390] sm:$0xff] }
 0x326   : > { %v1641_v54 = vmax.f32 %v1563_v47, 0.0  ;;  %2812 = vmatpush.bf16.msra.mxu2 %v4279_v41 }
 0x327   : > { %v1656_v56 = vpack.c.bf16 %v1640_v51, %v1640_v51  ;;  %2825 = vmatpush.bf16.msra.mxu3 %v4287_v44 }
 0x328   : > { %2845 = vmatpush.bf16.msrb.mxu1 %v4309_v37  ;;  %v1657_v58 = vpack.c.bf16 %v1641_v54, %v1641_v54  ;;  %v4312_v37 = vld [vmem:[%s4496_s16 + $0x348] sm:$0xff] }
 0x329   : > { %2884 = vmatpush.bf16.msra.mxu0 %v4333_v40  ;;  %2813 = vmatmul.bf16.vlgmr.msra.gmra.mxu2 %v1656_v56 }
 0x32a   : > { %2857 = vmatpush.bf16.msrb.mxu2 %v4318_v46  ;;  %2826 = vmatmul.bf16.vlgmr.msra.gmra.mxu3 %v1657_v58  ;;  %v1551_v62 = vpop.f32.mrf.mxu2  ;;  %v4319_v46 = vld [vmem:[%s4496_s16 + $0x380] sm:$0xff] }
 0x32b   : > { %2870 = vmatpush.bf16.msrb.mxu3 %v4326_v50  ;;  %v1564_v2 = vpop.f32.mrf.mxu3 }
 0x32c   : > { %2846 = vmatpush.bf16.msrb.mxu1 %v4308_v53  ;;  %v1588_v4 = vpop.f32.mrf.mxu1 }
 0x32d   : > { %2885 = vmatpush.bf16.msra.mxu0 %v4332_v55  ;;  %v1627_v6 = vpop.f32.mrf.mxu0  ;;  %v1589_v24 = vadd.f32 %v1588_v4, %v1256_v13 }
 0x32e   : > { %2858 = vmatpush.bf16.msrb.mxu2 %v4317_v57  ;;  %v1628_v26 = vadd.f32 %v1627_v6, %v1259_v15 }
 0x32f   : > { %2871 = vmatpush.bf16.msrb.mxu3 %v4325_v59  ;;  %v1643_v32 = vmax.f32 %v1589_v24, 0.0 }
 0x330   : > { %2847 = vmatpush.bf16.msrb.mxu1 %v4307_v61  ;;  %v1646_v35 = vmax.f32 %v1628_v26, 0.0 }
 0x331   : > { %2886 = vmatpush.bf16.msra.mxu0 %v4331_v1  ;;  %v1659_v41 = vpack.c.bf16 %v1643_v32, %v1643_v32  ;;  %v4964_v1 = vld [vmem:[%s4501_s2] sm:$0x3f] }
 0x332   : > { %2859 = vmatpush.bf16.msrb.mxu2 %v4316_v3  ;;  %v1601_v14 = vpop.f32.mrf.mxu2  ;;  %v1662_v42 = vpack.c.bf16 %v1646_v35, %v1646_v35  ;;  %v1919_v2 = vperm.slane %v4964_v1, 5 }
 0x333   : > { %2872 = vmatpush.bf16.msrb.mxu3 %v4324_v5  ;;  %v1614_v16 = vpop.f32.mrf.mxu3  ;;  %v1602_v38 = vadd.f32 %v1601_v14, %v1257_v28 }
 0x334   : > { %2848 = vmatpush.bf16.msrb.mxu1 %v4306_v7  ;;  %v1590_v19 = vpop.f32.mrf.mxu1  ;;  %v1615_v40 = vadd.f32 %v1614_v16, %v1258_v30 }
 0x335   : > { %2887 = vmatpush.bf16.msra.mxu0 %v4330_v10  ;;  %v1629_v22 = vpop.f32.mrf.mxu0  ;;  %v1644_v44 = vmax.f32 %v1602_v38, 0.0 }
 0x336   : > { %2860 = vmatpush.bf16.msrb.mxu2 %v4315_v45  ;;  %v1645_v47 = vmax.f32 %v1615_v40, 0.0 }
 0x337   : > { %2873 = vmatpush.bf16.msrb.mxu3 %v4323_v11  ;;  %v1660_v49 = vpack.c.bf16 %v1644_v44, %v1644_v44 }
 0x338   : > { %2849 = vmatpush.bf16.msrb.mxu1 %v4305_v12  ;;  %v1661_v50 = vpack.c.bf16 %v1645_v47, %v1645_v47 }
 0x339   : > { %2888 = vmatpush.bf16.msra.mxu0 %v4329_v63 }
 0x33a   : > { %2861 = vmatpush.bf16.msrb.mxu2 %v4314_v17  ;;  %v1603_v33 = vpop.f32.mrf.mxu2 }
 0x33b   : > { %2874 = vmatpush.bf16.msrb.mxu3 %v4322_v20  ;;  %v1616_v36 = vpop.f32.mrf.mxu3 }
 0x33c   : > { %2850 = vmatpush.bf16.msrb.mxu1 %v4304_v23 }
 0x33d   : > { %2889 = vmatpush.bf16.msra.mxu0 %v4328_v25 }
 0x33e   : > { %2862 = vmatpush.bf16.msrb.mxu2 %v4313_v27 }
 0x33f   : > { %2875 = vmatpush.bf16.msrb.mxu3 %v4321_v29 }
 0x340   : > { %2851 = vmatpush.bf16.msrb.mxu1 %v4303_v31 }
 0x341   : > { %2890 = vmatpush.bf16.msra.mxu0 %v4327_v34 }
 0x342   : > { %2863 = vmatpush.bf16.msrb.mxu2 %v4312_v37 }
 0x343   : > { %2876 = vmatpush.bf16.msrb.mxu3 %v4320_v39  ;;  %2852 = vmatmul.bf16.vlgmr.msrb.gmra.mxu1 %v1659_v41 }
 0x344   : > { %2891 = vmatmul.bf16.vlgmr.msra.gmra.mxu0 %v1662_v42 }
 0x346   : > { %2864 = vmatpush.bf16.msrb.mxu2 %v4311_v43 }
 0x347   : > { %2877 = vmatpush.bf16.msrb.mxu3 %v4319_v46 }
 0x349   : > { %2865 = vmatmul.bf16.vlgmr.msrb.gmra.mxu2 %v1660_v49 }
 0x34a   : > { %2878 = vmatmul.bf16.vlgmr.msrb.gmra.mxu3 %v1661_v50 }
 0x380   : > { %v2697_v51 = vpop.f32.mrf.mxu1 }
 0x381   : > { %v2736_v52 = vpop.f32.mrf.mxu0  ;;  %v2698_v5 = vadd.f32 %v2697_v51, %v1919_v2 }
 0x388   : > { %v2699_v53 = vpop.f32.mrf.mxu1 }
 0x389   : > { %v2738_v54 = vpop.f32.mrf.mxu0 }
 0x38a   : > { %v2919_v54 = vperm.slane %v4964_v1, 3 }
 0x38c   : > { %v2710_v55 = vpop.f32.mrf.mxu2 }
 0x38d   : > { %v2723_v56 = vpop.f32.mrf.mxu3  ;;  %v2711_v9 = vadd.f32 %v2710_v55, %v2698_v5 }
 0x38f   : > { %v2724_v45 = vadd.f32 %v2723_v56, %v2711_v9  ;;  %v2921_v56 = vperm.slane %v4964_v1, 4 }
 0x390   : > { %v2749_v57 = vpop.f32.mrf.mxu1 }
 0x391   : > { %v2788_v58 = vpop.f32.mrf.mxu0  ;;  %v2737_v13 = vadd.f32 %v2736_v52, %v2724_v45 }
 0x393   : > { %v2750_v15 = vadd.f32 %v2749_v57, %v2737_v13 }
 0x394   : > { %v2712_v59 = vpop.f32.mrf.mxu2 }
 0x395   : > { %v2725_v61 = vpop.f32.mrf.mxu3 }
 0x398   : > { %v2751_v62 = vpop.f32.mrf.mxu1 }
 0x399   : > { %v2790_v0 = vpop.f32.mrf.mxu0 }
 0x39c   : > { %v2762_v3 = vpop.f32.mrf.mxu2 }
 0x39d   : > { %v2775_v4 = vpop.f32.mrf.mxu3  ;;  %v2763_v16 = vadd.f32 %v2762_v3, %v2750_v15 }
 0x39f   : > { %v2776_v17 = vadd.f32 %v2775_v4, %v2763_v16 }
 0x3a0   : > { %v2801_v6 = vpop.f32.mrf.mxu1 }
 0x3a1   : > { %v2840_v7 = vpop.f32.mrf.mxu0  ;;  %v2789_v20 = vadd.f32 %v2788_v58, %v2776_v17 }
 0x3a3   : > { %v2802_v21 = vadd.f32 %v2801_v6, %v2789_v20 }
 0x3a4   : > { %v2764_v10 = vpop.f32.mrf.mxu2 }
 0x3a5   : > { %v2777_v48 = vpop.f32.mrf.mxu3 }
 0x3a8   : > { %v2803_v11 = vpop.f32.mrf.mxu1 }
 0x3a9   : > { %v2842_v12 = vpop.f32.mrf.mxu0 }
 0x3ac   : > { %v2814_v14 = vpop.f32.mrf.mxu2 }
 0x3ad   : > { %v2827_v63 = vpop.f32.mrf.mxu3  ;;  %v2815_v23 = vadd.f32 %v2814_v14, %v2802_v21 }
 0x3af   : > { %v2828_v25 = vadd.f32 %v2827_v63, %v2815_v23 }
 0x3b1   : > { %v2841_v27 = vadd.f32 %v2840_v7, %v2828_v25 }
 0x3b4   : > { %v2816_v18 = vpop.f32.mrf.mxu2 }
 0x3b5   : > { %v2829_v19 = vpop.f32.mrf.mxu3 }
 0x3c0   : > { %v2853_v22 = vpop.f32.mrf.mxu1 }
 0x3c1   : > { %v2892_v24 = vpop.f32.mrf.mxu0  ;;  %v2854_v29 = vadd.f32 %v2853_v22, %v2841_v27 }
 0x3c8   : > { %v2855_v26 = vpop.f32.mrf.mxu1 }
 0x3c9   : > { %v2894_v28 = vpop.f32.mrf.mxu0 }
 0x3cc   : > { %v2866_v30 = vpop.f32.mrf.mxu2 }
 0x3cd   : > { %v2867_v31 = vadd.f32 %v2866_v30, %v2854_v29  ;;  %v2879_v32 = vpop.f32.mrf.mxu3 }
 0x3cf   : > { %v2880_v33 = vadd.f32 %v2879_v32, %v2867_v31 }
 0x3d1   : > { %v2893_v34 = vadd.f32 %v2892_v24, %v2880_v33 }
 0x3d3   : > { %v2896_v35 = vadd.f32 %v2893_v34, %v4764_v8 }
 0x3d4   : > { %v2868_v36 = vpop.f32.mrf.mxu2 }
 0x3d5   : > { %v2881_v37 = vpop.f32.mrf.mxu3  ;;  %v2897_v38 = vsel %vm1135_vm2, %v2896_v35, 0.0 }
 0x3d6   : > { %2898 = vadd.xlane.f32.xlu1 %v2897_v38 }
 0x449   : > { %v2899_v39 = vpop.xlane.xlu1 %2898 }
 0x44a   : > { %v2900_v40 = vmul.f32 %v2899_v39, %v4715_v60 }
 0x44c   : > { %v2901_v41 = vsub.f32 %v2896_v35, %v2900_v40 }
 0x44e   : > { %v2902_v42 = vmul.f32 %v2901_v41, %v2901_v41 }
 0x450   : > { %v2903_v43 = vsel %vm1135_vm2, %v2902_v42, 0.0 }
 0x451   : > { %2904 = vadd.xlane.f32.xlu1 %v2903_v43 }
 0x4c4   : > { %v2905_v44 = vpop.xlane.xlu1 %2904 }
 0x4c5   : > { %v2906_v46 = vmul.f32 %v2905_v44, %v4715_v60 }
 0x4c7   : > { %v2907_v47 = vadd.f32 1e-05, %v2906_v46 }
 0x4c9   : > { %4356 = vrsqrt.f32 %v2907_v47  ;;  %vm2914_vm8 = vweird.f32 %v2907_v47 }
 0x4cf   : > { %v4357_v49 = vpop.eup %4356 }
 0x4d0   : > { %v2909_v8 = vmul.f32 %v4357_v49, %v2907_v47  ;;  %vm2915_vm7 = vweird.f32 %v4357_v49 }
 0x4d1   : > { %vm2916_vm9 = vmor %vm2914_vm8, %vm2915_vm7 }
 0x4d2   : > { %v2910_v50 = vmul.f32 %v4357_v49, %v2909_v8 }
 0x4d4   : > { %v2911_v51 = vmul.f32 0.5, %v2910_v50 }
 0x4d6   : > { %v2912_v52 = vsub.f32 1.5, %v2911_v51 }
 0x4d8   : > { %v2913_v53 = vmul.f32 %v4357_v49, %v2912_v52 }
 0x4da   : > { %v2917_v55 = vsel %vm2916_vm9, %v4357_v49, %v2913_v53 }
 0x4db   : > { %v2918_v57 = vmul.f32 %v2917_v55, %v2901_v41 }
 0x4dd   : > { %v2920_v58 = vmul.f32 %v2919_v54, %v2918_v57  ;;  %2927 = sbr.rel (%p4095_p5) target bundleno = 2189 (0x88d), region = 72 }
 0x4df   : > { %v2922_v59 = vadd.f32 %v2921_v56, %v2920_v58 }
 0x4e1   : > { %2923 = vst.msk [vmem:[#allocation2] sm:$0x3] %vm1135_vm2, %v2922_v59 }
 0x4e2   : > { %v2933_v61 = vld [vmem:[%s5046_s7 + $0x18] sm:$0xff]  ;;  %v2932_v62 = vld [vmem:[%s5046_s7 + $0x10] sm:$0xff]  ;;  %v2931_v0 = vld [vmem:[%s5046_s7 + $0x8] sm:$0xff] }
 0x4e3   : > { %2950 = vmatpush.msra.mxu0 %v2933_v61  ;;  %v2930_v1 = vld [vmem:[%s5046_s7] sm:$0xff]  ;;  %v4101_v13 = vld [vmem:[%s5046_s7 + $0x38] sm:$0xff]  ;;  %v4100_v14 = vld [vmem:[%s5046_s7 + $0x30] sm:$0xff] }
 0x4e4   : > { %v2929_v3 = vld [vmem:[%s5047_s8] sm:$0x7]  ;;  %3008 = vmatpush.msra.mxu1 %v4101_v13  ;;  %v4099_v63 = vld [vmem:[%s5046_s7 + $0x28] sm:$0xff]  ;;  %v4097_v31 = vld [vmem:[%s5047_s8 + $0x4] sm:$0x7] }
 0x4e5   : > { %2951 = vmatpush.msra.mxu0 %v2932_v62  ;;  %v2934_v4 = vperm.slane %v2929_v3, 0  ;;  %v4098_v15 = vld [vmem:[%s5046_s7 + $0x20] sm:$0xff]  ;;  %v2981_v25 = vperm.slane %v2929_v3, 1  ;;  %v2983_v28 = vperm.slane %v2929_v3, 2  ;;  %v2992_v32 = vperm.slane %v4097_v31, 0  ;;  %v3047_v42 = vld [vmem:[%s5048_s9 + $0x18] sm:$0xff] }
 0x4e6   : > { %3009 = vmatpush.msra.mxu1 %v4100_v14  ;;  %v3046_v43 = vld [vmem:[%s5048_s9 + $0x10] sm:$0xff]  ;;  %3064 = vmatpush.msra.mxu2 %v3047_v42  ;;  %v3045_v44 = vld [vmem:[%s5048_s9 + $0x8] sm:$0xff]  ;;  %v3044_v46 = vld [vmem:[%s5048_s9] sm:$0xff]  ;;  %v3039_v56 = vperm.slane %v4097_v31, 1  ;;  %v3041_v59 = vperm.slane %v4097_v31, 2 }
 0x4e7   : > { %2952 = vmatpush.msra.mxu0 %v2931_v0 }
 0x4e8   : > { %v2928_v2 = vld [vmem:[#allocation2] sm:$0x3]  ;;  %3010 = vmatpush.msra.mxu1 %v4099_v63  ;;  %3065 = vmatpush.msra.mxu2 %v3046_v43 }
 0x4e9   : > { %2953 = vmatpush.msra.mxu0 %v2930_v1 }
 0x4ea   : > { %4096 = vmatmul.msk.f32.vlgmr.msra.gmra.mxu0 %vm1110_vm1, %v2928_v2  ;;  %3011 = vmatpush.msra.mxu1 %v4098_v15 }
 0x4eb   : > { %3066 = vmatpush.msra.mxu2 %v3045_v44 }
 0x4ed   : > { %3067 = vmatpush.msra.mxu2 %v3044_v46 }
 0x567   : > { %v2955_v5 = vpop.f32.mrf.mxu0 }
 0x568   : > { %v2956_v6 = vadd.f32 %v2955_v5, %v2934_v4 }
 0x56a   : > { %v2958_v7 = vmax.f32 %v2956_v6, 0.0 }
 0x56c   : > { %v2959_v9 = vsel %vm1135_vm2, %v2958_v7, 0.0 }
 0x56d   : > { %2960 = vadd.xlane.f32.xlu0 %v2959_v9 }
 0x5e0   : > { %v2961_v10 = vpop.xlane.xlu0 %2960 }
 0x5e1   : > { %v2962_v48 = vmul.f32 %v2961_v10, %v4715_v60 }
 0x5e3   : > { %v2963_v45 = vsub.f32 %v2958_v7, %v2962_v48 }
 0x5e5   : > { %v2964_v11 = vmul.f32 %v2963_v45, %v2963_v45 }
 0x5e7   : > { %v2965_v12 = vsel %vm1135_vm2, %v2964_v11, 0.0 }
 0x5e8   : > { %2966 = vadd.xlane.f32.xlu0 %v2965_v12 }
 0x65b   : > { %v2967_v16 = vpop.xlane.xlu0 %2966 }
 0x65c   : > { %v2968_v17 = vmul.f32 %v2967_v16, %v4715_v60 }
 0x65e   : > { %v2969_v18 = vadd.f32 1e-05, %v2968_v17 }
 0x660   : > { %4360 = vrsqrt.f32 %v2969_v18  ;;  %vm2976_vm11 = vweird.f32 %v2969_v18 }
 0x666   : > { %v4361_v19 = vpop.eup %4360 }
 0x667   : > { %v2971_v20 = vmul.f32 %v4361_v19, %v2969_v18  ;;  %vm2977_vm10 = vweird.f32 %v4361_v19 }
 0x668   : > { %vm2978_vm12 = vmor %vm2976_vm11, %vm2977_vm10 }
 0x669   : > { %v2972_v21 = vmul.f32 %v4361_v19, %v2971_v20 }
 0x66b   : > { %v2973_v22 = vmul.f32 0.5, %v2972_v21 }
 0x66d   : > { %v2974_v23 = vsub.f32 1.5, %v2973_v22 }
 0x66f   : > { %v2975_v24 = vmul.f32 %v4361_v19, %v2974_v23 }
 0x671   : > { %v2979_v26 = vsel %vm2978_vm12, %v4361_v19, %v2975_v24 }
 0x672   : > { %v2980_v27 = vmul.f32 %v2979_v26, %v2963_v45 }
 0x674   : > { %v2982_v29 = vmul.f32 %v2981_v25, %v2980_v27 }
 0x676   : > { %v2984_v30 = vadd.f32 %v2983_v28, %v2982_v29 }
 0x678   : > { %4102 = vmatmul.msk.f32.vlgmr.msra.gmra.mxu1 %vm1110_vm1, %v2984_v30 }
 0x6f5   : > { %v3013_v33 = vpop.f32.mrf.mxu1 }
 0x6f6   : > { %v3014_v34 = vadd.f32 %v3013_v33, %v2992_v32 }
 0x6f8   : > { %v3016_v35 = vmax.f32 %v3014_v34, 0.0 }
 0x6fa   : > { %v3017_v36 = vsel %vm1135_vm2, %v3016_v35, 0.0 }
 0x6fb   : > { %3018 = vadd.xlane.f32.xlu1 %v3017_v36 }
 0x76e   : > { %v3019_v37 = vpop.xlane.xlu1 %3018 }
 0x76f   : > { %v3020_v38 = vmul.f32 %v3019_v37, %v4715_v60 }
 0x771   : > { %v3021_v39 = vsub.f32 %v3016_v35, %v3020_v38 }
 0x773   : > { %v3022_v40 = vmul.f32 %v3021_v39, %v3021_v39 }
 0x775   : > { %v3023_v41 = vsel %vm1135_vm2, %v3022_v40, 0.0 }
 0x776   : > { %3024 = vadd.xlane.f32.xlu1 %v3023_v41 }
 0x7e9   : > { %v3025_v47 = vpop.xlane.xlu1 %3024 }
 0x7ea   : > { %v3026_v49 = vmul.f32 %v3025_v47, %v4715_v60  ;;  %v4359_v60 = vld [vmem:[%s5049_s10 + $0x1] ss:$0 sm:$0xff] }
 0x7ec   : > { %v3027_v8 = vadd.f32 1e-05, %v3026_v49 }
 0x7ee   : > { %4362 = vrsqrt.f32 %v3027_v8  ;;  %vm3034_vm14 = vweird.f32 %v3027_v8 }
 0x7f4   : > { %v4363_v50 = vpop.eup %4362 }
 0x7f5   : > { %v3029_v51 = vmul.f32 %v4363_v50, %v3027_v8  ;;  %vm3035_vm13 = vweird.f32 %v4363_v50 }
 0x7f6   : > { %vm3036_vm15 = vmor %vm3034_vm14, %vm3035_vm13 }
 0x7f7   : > { %v3030_v52 = vmul.f32 %v4363_v50, %v3029_v51 }
 0x7f9   : > { %v3031_v53 = vmul.f32 0.5, %v3030_v52 }
 0x7fb   : > { %v3032_v54 = vsub.f32 1.5, %v3031_v53 }
 0x7fd   : > { %v3033_v55 = vmul.f32 %v4363_v50, %v3032_v54 }
 0x7ff   : > { %v3037_v57 = vsel %vm3036_vm15, %v4363_v50, %v3033_v55 }
 0x800   : > { %v3038_v58 = vmul.f32 %v3037_v57, %v3021_v39 }
 0x802   : > { %v3040_v61 = vmul.f32 %v3039_v56, %v3038_v58 }
 0x804   : > { %v3042_v62 = vadd.f32 %v3041_v59, %v3040_v61 }
 0x806   : > { %4103 = vmatmul.msk.f32.vlgmr.msra.gmra.mxu2 %vm1110_vm1, %v3042_v62 }
 0x889   : > { %v3069_v0 = vpop.f32.mrf.mxu2 }
 0x88a   : > { %v3070_v1 = vadd.f32 %v4359_v60, %v3069_v0 }
 0x88c   : > { %3072 = vst [vmem:[#allocation3] sm:$0x3] %v3070_v1 }
 0x88d PF: > { %p4339_p6 = scmp.eq.s32.totalorder %s4472_s18, 1  ;;  %s4405_s20 = smov [#allocation3]  }
 0x88e   : > { %s3079_s23 = sshll.u32 %s4405_s20, 4  ;;  %s3081_s26 = sshll.u32 %s5050_s11, 4  ;;  %s3080_s23 = int_to_ptr.vmem [resolvable:$true] %s3079_s23  ;;  %s3082_s26 = int_to_ptr.hbm [resolvable:$true] %s3081_s26 }
 0x88f   : > { %4336 = dma.vmem_to_hbm [thread:$0]  (%p4339_p6), %s3080_s23, 32, %s3082_s26, [#allocation4]  }
 0x890   : > { %4397 = dma.done.wait (%p4339_p6), [#allocation4], 32  }
 0x891   : > { %4399 = vsyncadd (%p4339_p6), [#allocation4], 4294967264 }
 0x892 PF: > { %s22_s17 = sadd.s32 1, %s4402_s17  }
 0x893   : > { %p19_p7 = scmp.ge.s32.totalorder %s22_s17, 4  }
 0x895   :  { %21 = sbr.rel (!%p19_p7) target bundleno = 3 (0x3), region = 114 }
 0x89a   :  { %3095 = vsyncpa [#allocation4], 1 }
 0x89b   :  { %3097 = vsyncpa [#allocation4 + $0x1], 1 }

</bundles_post_ra>
